<compile_context>
chip_gen: v5e
topology: v5e:2x2
jax: 0.10.0
libtpu: 0.0.40
codegen_flags: <defaults>
</compile_context>

<pallas_src>
import math

import jax
import jax.numpy as jnp
from jax.experimental import pallas as pl
from jax.experimental.pallas import tpu as pltpu  # noqa: F401  (kept for CompilerParams if scaled up)

# ---------------- tiny BERT config ----------------
VOCAB      = 100
HIDDEN     = 32
NUM_HEADS  = 2
HEAD_DIM   = HIDDEN // NUM_HEADS
INTER      = 64
NUM_LAYERS = 2
MAX_POS    = 16
NUM_LABELS = 3
FC1_DIM    = 128
LN_EPS     = 1e-12


# ---------------- fused forward kernel ----------------
def _layer_norm(x, g, b):
    mu = jnp.mean(x, axis=-1, keepdims=True)
    var = jnp.mean(jnp.square(x - mu), axis=-1, keepdims=True)
    return (x - mu) * jax.lax.rsqrt(var + LN_EPS) * g + b


def _fused_forward_kernel(
        emb_ref, mask_ref, sub_ref, oh_ref,
        emb_ln_g_ref, emb_ln_b_ref,
        wqkv_ref, bqkv_ref, wo_ref, bo_ref, ln1_g_ref, ln1_b_ref,
        wi_ref, bi_ref, wo2_ref, bo2_ref, ln2_g_ref, ln2_b_ref,
        wp_ref, bp_ref, w1h_ref, w1s_ref, b1_ref, w2_ref, b2_ref,
        logits_ref, loss_ref):
    B = mask_ref.shape[0]
    S = mask_ref.shape[2]
    H = emb_ref.shape[1]
    BS = B * S
    scale = 1.0 / math.sqrt(HEAD_DIM)

    # embedding LayerNorm (no residual; no zeros array needed)
    x = _layer_norm(emb_ref[...], emb_ln_g_ref[...], emb_ln_b_ref[...])   # (B*S, H)
    mb = mask_ref[...]                                                    # (B, 1, S) additive bias

    for l in range(NUM_LAYERS):                       # static unrolled layer loop
        # ---- self-attention: one packed QKV matmul (lane-denser than 3 small ones) ----
        qkv = jnp.dot(x, wqkv_ref[l], preferred_element_type=jnp.float32) + bqkv_ref[l]  # (BS, 3H)
        wo_l = wo_ref[l]                                                  # (H, H)
        ctx_out = None
        for h in range(NUM_HEADS):                    # static unrolled head loop (2 heads)
            lo = h * HEAD_DIM
            q = qkv[:, lo:lo + HEAD_DIM].reshape(B, S, HEAD_DIM)
            k = qkv[:, H + lo:H + lo + HEAD_DIM].reshape(B, S, HEAD_DIM)
            v = qkv[:, 2 * H + lo:2 * H + lo + HEAD_DIM].reshape(B, S, HEAD_DIM)
            s = jnp.einsum('bqd,bkd->bqk', q, k,
                           preferred_element_type=jnp.float32) * scale + mb
            m = jnp.max(s, axis=-1, keepdims=True)
            p = jnp.exp(s - m)
            p = p / jnp.sum(p, axis=-1, keepdims=True)
            ctx = jnp.einsum('bqk,bkd->bqd', p, v,
                             preferred_element_type=jnp.float32).reshape(BS, HEAD_DIM)
            # fold the lane-axis head concat into Wo: per-head row block of Wo
            part = jnp.dot(ctx, wo_l[lo:lo + HEAD_DIM, :],
                           preferred_element_type=jnp.float32)
            ctx_out = part if ctx_out is None else ctx_out + part
        attn = ctx_out + bo_ref[l]
        x = _layer_norm(attn + x, ln1_g_ref[l], ln1_b_ref[l])             # residual + LN fused

        # ---- FFN: wi + gelu + wo2 fused; intermediate never leaves VMEM ----
        inter = jnp.dot(x, wi_ref[l], preferred_element_type=jnp.float32) + bi_ref[l]
        # TODO(synk): HF BERT uses exact (erf) gelu; tanh approximation kept here.
        inter = jax.nn.gelu(inter, approximate=True)
        ffn = jnp.dot(inter, wo2_ref[l], preferred_element_type=jnp.float32) + bo2_ref[l]
        x = _layer_norm(ffn + x, ln2_g_ref[l], ln2_b_ref[l])              # residual + LN fused

    # ---- pooler on the CLS token ----
    cls = x.reshape(B, S, H)[:, 0, :]                                     # (B, H)
    pooled = jnp.tanh(jnp.dot(cls, wp_ref[...],
                              preferred_element_type=jnp.float32) + bp_ref[...])

    # ---- head: cat(pooled, subscribers) folded into split fc1 weights ----
    hid = (jnp.dot(pooled, w1h_ref[...], preferred_element_type=jnp.float32)
           + sub_ref[...] * w1s_ref[...] + b1_ref[...])                   # (B, FC1)
    hid = jnp.maximum(hid, 0.0)
    logits = jnp.dot(hid, w2_ref[...], preferred_element_type=jnp.float32) + b2_ref[...]
    logits_ref[...] = logits

    # mean cross-entropy (matches nn.CrossEntropyLoss with class-index labels)
    m = jnp.max(logits, axis=-1, keepdims=True)
    lse = jnp.log(jnp.sum(jnp.exp(logits - m), axis=-1, keepdims=True)) + m
    logp = logits - lse
    nll = -jnp.sum(oh_ref[...] * logp, axis=-1, keepdims=True)            # (B, 1)
    loss_ref[...] = jnp.mean(nll, axis=0, keepdims=True)                  # (1, 1)


# ---------------- parameters (deterministic synthetic init) ----------------
def init_params(key):
    keys = iter(jax.random.split(key, 8 + NUM_LAYERS * 16))

    def w(shape):
        return 0.02 * jax.random.normal(next(keys), shape, jnp.float32)

    def zeros(shape):
        return jnp.zeros(shape, jnp.float32)

    params = {
        "word_emb": w((VOCAB, HIDDEN)),
        "pos_emb":  w((MAX_POS, HIDDEN)),
        "type_emb": w((2, HIDDEN)),
        "emb_ln_g": jnp.ones((1, HIDDEN), jnp.float32),
        "emb_ln_b": zeros((1, HIDDEN)),
        "layers": [],
        "wp": w((HIDDEN, HIDDEN)), "bp": zeros((1, HIDDEN)),           # pooler
        "w1": w((HIDDEN + 1, FC1_DIM)), "b1": zeros((1, FC1_DIM)),     # fc1
        "w2": w((FC1_DIM, NUM_LABELS)), "b2": zeros((1, NUM_LABELS)),  # fc2
    }
    for _ in range(NUM_LAYERS):
        params["layers"].append({
            "wq": w((HIDDEN, HIDDEN)), "bq": zeros((1, HIDDEN)),
            "wk": w((HIDDEN, HIDDEN)), "bk": zeros((1, HIDDEN)),
            "wv": w((HIDDEN, HIDDEN)), "bv": zeros((1, HIDDEN)),
            "wo": w((HIDDEN, HIDDEN)), "bo": zeros((1, HIDDEN)),
            "attn_ln_g": jnp.ones((1, HIDDEN), jnp.float32),
            "attn_ln_b": zeros((1, HIDDEN)),
            "wi":  w((HIDDEN, INTER)), "bi":  zeros((1, INTER)),
            "wo2": w((INTER, HIDDEN)), "bo2": zeros((1, HIDDEN)),
            "out_ln_g": jnp.ones((1, HIDDEN), jnp.float32),
            "out_ln_b": zeros((1, HIDDEN)),
        })
    return params


def pack_params(params):
    """Pack per-layer weights into stacked arrays for the single fused kernel."""
    ls = params["layers"]
    return {
        "word_emb": params["word_emb"],
        "pos_emb":  params["pos_emb"],
        "type_emb": params["type_emb"],
        "emb_ln_g": params["emb_ln_g"], "emb_ln_b": params["emb_ln_b"],
        # Wq|Wk|Wv packed along the output (lane) axis -> one (H, 3H) matmul
        "wqkv": jnp.stack([jnp.concatenate([lp["wq"], lp["wk"], lp["wv"]], axis=1) for lp in ls]),
        "bqkv": jnp.stack([jnp.concatenate([lp["bq"], lp["bk"], lp["bv"]], axis=1) for lp in ls]),
        "wo":   jnp.stack([lp["wo"] for lp in ls]),
        "bo":   jnp.stack([lp["bo"] for lp in ls]),
        "ln1_g": jnp.stack([lp["attn_ln_g"] for lp in ls]),
        "ln1_b": jnp.stack([lp["attn_ln_b"] for lp in ls]),
        "wi":   jnp.stack([lp["wi"] for lp in ls]),
        "bi":   jnp.stack([lp["bi"] for lp in ls]),
        "wo2":  jnp.stack([lp["wo2"] for lp in ls]),
        "bo2":  jnp.stack([lp["bo2"] for lp in ls]),
        "ln2_g": jnp.stack([lp["out_ln_g"] for lp in ls]),
        "ln2_b": jnp.stack([lp["out_ln_b"] for lp in ls]),
        "wp": params["wp"], "bp": params["bp"],
        # split fc1 so cat(pooled, subscribers) becomes matmul + rank-1 broadcast
        "w1h": params["w1"][:HIDDEN, :],
        "w1s": params["w1"][HIDDEN:HIDDEN + 1, :],
        "b1": params["b1"], "w2": params["w2"], "b2": params["b2"],
    }


# ---------------- forward (matches MultimodalBertModel.forward) ----------------
def multimodal_bert_forward(pp, input_ids, attention_mask, subscribers, labels=None):
    B, S = input_ids.shape

    # glue: embedding gathers (word + position + token_type=0) stay in plain JAX
    emb = (pp["word_emb"][input_ids]
           + pp["pos_emb"][jnp.arange(S)][None, :, :]
           + pp["type_emb"][0][None, None, :]).reshape(B * S, HIDDEN).astype(jnp.float32)

    # HF-style additive attention mask: 0 where attended, -1e9 where masked
    mask_bias = ((attention_mask.astype(jnp.float32) - 1.0) * 1e9).reshape(B, 1, S)
    sub = subscribers.astype(jnp.float32).reshape(B, 1)
    if labels is None:
        onehot = jnp.zeros((B, NUM_LABELS), jnp.float32)
    else:
        onehot = jax.nn.one_hot(labels, NUM_LABELS, dtype=jnp.float32)

    logits, loss = pl.pallas_call(
        _fused_forward_kernel,
        out_shape=(jax.ShapeDtypeStruct((B, NUM_LABELS), jnp.float32),
                   jax.ShapeDtypeStruct((1, 1), jnp.float32)),
    )(emb, mask_bias, sub, onehot,
      pp["emb_ln_g"], pp["emb_ln_b"],
      pp["wqkv"], pp["bqkv"], pp["wo"], pp["bo"], pp["ln1_g"], pp["ln1_b"],
      pp["wi"], pp["bi"], pp["wo2"], pp["bo2"], pp["ln2_g"], pp["ln2_b"],
      pp["wp"], pp["bp"], pp["w1h"], pp["w1s"], pp["b1"], pp["w2"], pp["b2"])

    if labels is None:
        return None, logits
    return loss[0, 0], logits


# ---------------- run ----------------
if __name__ == "__main__":
    B, S = 2, 8
    root = jax.random.PRNGKey(0)
    k_param, k_ids, k_sub = jax.random.split(root, 3)

    params = init_params(k_param)
    packed = pack_params(params)

    input_ids = jax.random.randint(k_ids, (B, S), 0, VOCAB, dtype=jnp.int32)
    attention_mask = jnp.array([[1, 1, 1, 1, 1, 1, 1, 1],
                                [1, 1, 1, 1, 1, 1, 0, 0]], dtype=jnp.int32)
    subscribers = jax.random.uniform(k_sub, (B,), jnp.float32)
    labels = jnp.array([0, 2], dtype=jnp.int32)

    loss, logits = multimodal_bert_forward(packed, input_ids, attention_mask,
                                           subscribers, labels)
    loss = jax.block_until_ready(loss)
    logits = jax.block_until_ready(logits)

    assert logits.shape == (B, NUM_LABELS)
    assert loss.shape == ()
    assert bool(jnp.isfinite(loss)) and bool(jnp.all(jnp.isfinite(logits)))
    print("KERNEL_OK")
</pallas_src>

<mosaic_0001>
module attributes {stable_mosaic.version = 11 : i64} {
  func.func @_fused_forward_kernel(%arg0: memref<16x32xf32, #tpu.memory_space<vmem>>, %arg1: memref<2x1x8xf32, #tpu.memory_space<vmem>>, %arg2: memref<2x1xf32, #tpu.memory_space<vmem>>, %arg3: memref<2x3xf32, #tpu.memory_space<vmem>>, %arg4: memref<1x32xf32, #tpu.memory_space<vmem>>, %arg5: memref<1x32xf32, #tpu.memory_space<vmem>>, %arg6: memref<2x32x96xf32, #tpu.memory_space<vmem>>, %arg7: memref<2x1x96xf32, #tpu.memory_space<vmem>>, %arg8: memref<2x32x32xf32, #tpu.memory_space<vmem>>, %arg9: memref<2x1x32xf32, #tpu.memory_space<vmem>>, %arg10: memref<2x1x32xf32, #tpu.memory_space<vmem>>, %arg11: memref<2x1x32xf32, #tpu.memory_space<vmem>>, %arg12: memref<2x32x64xf32, #tpu.memory_space<vmem>>, %arg13: memref<2x1x64xf32, #tpu.memory_space<vmem>>, %arg14: memref<2x64x32xf32, #tpu.memory_space<vmem>>, %arg15: memref<2x1x32xf32, #tpu.memory_space<vmem>>, %arg16: memref<2x1x32xf32, #tpu.memory_space<vmem>>, %arg17: memref<2x1x32xf32, #tpu.memory_space<vmem>>, %arg18: memref<32x32xf32, #tpu.memory_space<vmem>>, %arg19: memref<1x32xf32, #tpu.memory_space<vmem>>, %arg20: memref<32x128xf32, #tpu.memory_space<vmem>>, %arg21: memref<1x128xf32, #tpu.memory_space<vmem>>, %arg22: memref<1x128xf32, #tpu.memory_space<vmem>>, %arg23: memref<128x3xf32, #tpu.memory_space<vmem>>, %arg24: memref<1x3xf32, #tpu.memory_space<vmem>>, %arg25: memref<2x3xf32, #tpu.memory_space<vmem>>, %arg26: memref<1x1xf32, #tpu.memory_space<vmem>>) attributes {dimension_semantics = [], scalar_prefetch = 0 : i64, scratch_operands = 0 : i64, tpu.core_type = #tpu.core_type<tc>} {
    %c0 = arith.constant 0 : index
    %c0_0 = arith.constant 0 : index
    %0 = vector.load %arg0[%c0, %c0_0] : memref<16x32xf32, #tpu.memory_space<vmem>>, vector<16x32xf32>
    %c0_1 = arith.constant 0 : index
    %c0_2 = arith.constant 0 : index
    %1 = vector.load %arg4[%c0_1, %c0_2] : memref<1x32xf32, #tpu.memory_space<vmem>>, vector<1x32xf32>
    %c0_3 = arith.constant 0 : index
    %c0_4 = arith.constant 0 : index
    %2 = vector.load %arg5[%c0_3, %c0_4] : memref<1x32xf32, #tpu.memory_space<vmem>>, vector<1x32xf32>
    %cst = arith.constant dense<0.000000e+00> : vector<16xf32>
    %3 = vector.multi_reduction <add>, %0, %cst [1] : vector<16x32xf32> to vector<16xf32>
    %4 = vector.shape_cast %3 : vector<16xf32> to vector<16x1xf32>
    %cst_5 = arith.constant 3.200000e+01 : f32
    %5 = vector.broadcast %cst_5 : f32 to vector<16x1xf32>
    %6 = arith.divf %4, %5 : vector<16x1xf32>
    %7 = vector.broadcast %6 : vector<16x1xf32> to vector<16x32xf32>
    %8 = arith.subf %0, %7 : vector<16x32xf32>
    %9 = arith.mulf %8, %8 : vector<16x32xf32>
    %cst_6 = arith.constant dense<0.000000e+00> : vector<16xf32>
    %10 = vector.multi_reduction <add>, %9, %cst_6 [1] : vector<16x32xf32> to vector<16xf32>
    %11 = vector.shape_cast %10 : vector<16xf32> to vector<16x1xf32>
    %cst_7 = arith.constant 3.200000e+01 : f32
    %12 = vector.broadcast %cst_7 : f32 to vector<16x1xf32>
    %13 = arith.divf %11, %12 : vector<16x1xf32>
    %14 = vector.broadcast %6 : vector<16x1xf32> to vector<16x32xf32>
    %15 = arith.subf %0, %14 : vector<16x32xf32>
    %cst_8 = arith.constant 9.99999996E-13 : f32
    %16 = vector.broadcast %cst_8 : f32 to vector<16x1xf32>
    %17 = arith.addf %13, %16 : vector<16x1xf32>
    %18 = math.rsqrt %17 : vector<16x1xf32>
    %19 = vector.broadcast %18 : vector<16x1xf32> to vector<16x32xf32>
    %20 = arith.mulf %15, %19 : vector<16x32xf32>
    %21 = vector.broadcast %1 : vector<1x32xf32> to vector<16x32xf32>
    %22 = arith.mulf %20, %21 : vector<16x32xf32>
    %23 = vector.broadcast %2 : vector<1x32xf32> to vector<16x32xf32>
    %24 = arith.addf %22, %23 : vector<16x32xf32>
    %c0_9 = arith.constant 0 : index
    %c0_10 = arith.constant 0 : index
    %c0_11 = arith.constant 0 : index
    %25 = vector.load %arg1[%c0_9, %c0_10, %c0_11] : memref<2x1x8xf32, #tpu.memory_space<vmem>>, vector<2x1x8xf32>
    %c0_12 = arith.constant 0 : index
    %c0_13 = arith.constant 0 : index
    %c0_14 = arith.constant 0 : index
    %26 = vector.load %arg6[%c0_12, %c0_13, %c0_14] : memref<2x32x96xf32, #tpu.memory_space<vmem>>, vector<1x32x96xf32>
    %27 = vector.shape_cast %26 : vector<1x32x96xf32> to vector<32x96xf32>
    %cst_15 = arith.constant dense<0.000000e+00> : vector<16x96xf32>
    %28 = tpu.matmul %24, %27, %cst_15 {dimension_numbers = #tpu.dot_dimension_numbers<[1], [0], [0], [1], [0, 0, 1, 1], [], []>} : vector<16x32xf32>, vector<32x96xf32>, vector<16x96xf32> -> vector<16x96xf32>
    %c0_16 = arith.constant 0 : index
    %c0_17 = arith.constant 0 : index
    %c0_18 = arith.constant 0 : index
    %29 = vector.load %arg7[%c0_16, %c0_17, %c0_18] : memref<2x1x96xf32, #tpu.memory_space<vmem>>, vector<1x1x96xf32>
    %30 = vector.shape_cast %29 : vector<1x1x96xf32> to vector<1x96xf32>
    %31 = vector.broadcast %30 : vector<1x96xf32> to vector<16x96xf32>
    %32 = arith.addf %28, %31 : vector<16x96xf32>
    %c0_19 = arith.constant 0 : index
    %c0_20 = arith.constant 0 : index
    %c0_21 = arith.constant 0 : index
    %33 = vector.load %arg8[%c0_19, %c0_20, %c0_21] : memref<2x32x32xf32, #tpu.memory_space<vmem>>, vector<1x32x32xf32>
    %34 = vector.shape_cast %33 : vector<1x32x32xf32> to vector<32x32xf32>
    %35 = vector.extract_strided_slice %32 {offsets = [0, 0], sizes = [16, 16], strides = [1, 1]} : vector<16x96xf32> to vector<16x16xf32>
    %36 = vector.shape_cast %35 : vector<16x16xf32> to vector<2x8x16xf32>
    %37 = vector.extract_strided_slice %32 {offsets = [0, 32], sizes = [16, 16], strides = [1, 1]} : vector<16x96xf32> to vector<16x16xf32>
    %38 = vector.shape_cast %37 : vector<16x16xf32> to vector<2x8x16xf32>
    %39 = vector.extract_strided_slice %32 {offsets = [0, 64], sizes = [16, 16], strides = [1, 1]} : vector<16x96xf32> to vector<16x16xf32>
    %40 = vector.shape_cast %39 : vector<16x16xf32> to vector<2x8x16xf32>
    "tpu.trace_start"() <{level = 10 : i32, message = "bqd,bkd->bqk"}> : () -> ()
    %cst_22 = arith.constant dense<0.000000e+00> : vector<2x8x8xf32>
    %41 = tpu.matmul %36, %38, %cst_22 {dimension_numbers = #tpu.dot_dimension_numbers<[2], [2], [1], [1], [0, 0, 0, 1, 1, 1], [0], [0]>} : vector<2x8x16xf32>, vector<2x8x16xf32>, vector<2x8x8xf32> -> vector<2x8x8xf32>
    "tpu.trace_stop"() : () -> ()
    %cst_23 = arith.constant 2.500000e-01 : f32
    %42 = vector.broadcast %cst_23 : f32 to vector<2x8x8xf32>
    %43 = arith.mulf %41, %42 : vector<2x8x8xf32>
    %44 = vector.broadcast %25 : vector<2x1x8xf32> to vector<2x8x8xf32>
    %45 = arith.addf %43, %44 : vector<2x8x8xf32>
    %cst_24 = arith.constant dense<0xFF800000> : vector<2x8xf32>
    %46 = vector.multi_reduction <maximumf>, %45, %cst_24 [2] : vector<2x8x8xf32> to vector<2x8xf32>
    %47 = vector.shape_cast %46 : vector<2x8xf32> to vector<2x8x1xf32>
    %48 = vector.broadcast %47 : vector<2x8x1xf32> to vector<2x8x8xf32>
    %49 = arith.subf %45, %48 : vector<2x8x8xf32>
    %50 = math.exp %49 : vector<2x8x8xf32>
    %cst_25 = arith.constant dense<0.000000e+00> : vector<2x8xf32>
    %51 = vector.multi_reduction <add>, %50, %cst_25 [2] : vector<2x8x8xf32> to vector<2x8xf32>
    %52 = vector.shape_cast %51 : vector<2x8xf32> to vector<2x8x1xf32>
    %53 = vector.broadcast %52 : vector<2x8x1xf32> to vector<2x8x8xf32>
    %54 = arith.divf %50, %53 : vector<2x8x8xf32>
    "tpu.trace_start"() <{level = 10 : i32, message = "bqk,bkd->bqd"}> : () -> ()
    %cst_26 = arith.constant dense<0.000000e+00> : vector<2x8x16xf32>
    %55 = tpu.matmul %54, %40, %cst_26 {dimension_numbers = #tpu.dot_dimension_numbers<[2], [1], [1], [2], [0, 0, 0, 1, 1, 2], [0], [0]>} : vector<2x8x8xf32>, vector<2x8x16xf32>, vector<2x8x16xf32> -> vector<2x8x16xf32>
    "tpu.trace_stop"() : () -> ()
    %56 = vector.shape_cast %55 : vector<2x8x16xf32> to vector<16x16xf32>
    %57 = vector.extract_strided_slice %34 {offsets = [0, 0], sizes = [16, 32], strides = [1, 1]} : vector<32x32xf32> to vector<16x32xf32>
    %cst_27 = arith.constant dense<0.000000e+00> : vector<16x32xf32>
    %58 = tpu.matmul %56, %57, %cst_27 {dimension_numbers = #tpu.dot_dimension_numbers<[1], [0], [0], [1], [0, 0, 1, 1], [], []>} : vector<16x16xf32>, vector<16x32xf32>, vector<16x32xf32> -> vector<16x32xf32>
    %59 = vector.extract_strided_slice %32 {offsets = [0, 16], sizes = [16, 16], strides = [1, 1]} : vector<16x96xf32> to vector<16x16xf32>
    %60 = vector.shape_cast %59 : vector<16x16xf32> to vector<2x8x16xf32>
    %61 = vector.extract_strided_slice %32 {offsets = [0, 48], sizes = [16, 16], strides = [1, 1]} : vector<16x96xf32> to vector<16x16xf32>
    %62 = vector.shape_cast %61 : vector<16x16xf32> to vector<2x8x16xf32>
    %63 = vector.extract_strided_slice %32 {offsets = [0, 80], sizes = [16, 16], strides = [1, 1]} : vector<16x96xf32> to vector<16x16xf32>
    %64 = vector.shape_cast %63 : vector<16x16xf32> to vector<2x8x16xf32>
    "tpu.trace_start"() <{level = 10 : i32, message = "bqd,bkd->bqk"}> : () -> ()
    %cst_28 = arith.constant dense<0.000000e+00> : vector<2x8x8xf32>
    %65 = tpu.matmul %60, %62, %cst_28 {dimension_numbers = #tpu.dot_dimension_numbers<[2], [2], [1], [1], [0, 0, 0, 1, 1, 1], [0], [0]>} : vector<2x8x16xf32>, vector<2x8x16xf32>, vector<2x8x8xf32> -> vector<2x8x8xf32>
    "tpu.trace_stop"() : () -> ()
    %cst_29 = arith.constant 2.500000e-01 : f32
    %66 = vector.broadcast %cst_29 : f32 to vector<2x8x8xf32>
    %67 = arith.mulf %65, %66 : vector<2x8x8xf32>
    %68 = vector.broadcast %25 : vector<2x1x8xf32> to vector<2x8x8xf32>
    %69 = arith.addf %67, %68 : vector<2x8x8xf32>
    %cst_30 = arith.constant dense<0xFF800000> : vector<2x8xf32>
    %70 = vector.multi_reduction <maximumf>, %69, %cst_30 [2] : vector<2x8x8xf32> to vector<2x8xf32>
    %71 = vector.shape_cast %70 : vector<2x8xf32> to vector<2x8x1xf32>
    %72 = vector.broadcast %71 : vector<2x8x1xf32> to vector<2x8x8xf32>
    %73 = arith.subf %69, %72 : vector<2x8x8xf32>
    %74 = math.exp %73 : vector<2x8x8xf32>
    %cst_31 = arith.constant dense<0.000000e+00> : vector<2x8xf32>
    %75 = vector.multi_reduction <add>, %74, %cst_31 [2] : vector<2x8x8xf32> to vector<2x8xf32>
    %76 = vector.shape_cast %75 : vector<2x8xf32> to vector<2x8x1xf32>
    %77 = vector.broadcast %76 : vector<2x8x1xf32> to vector<2x8x8xf32>
    %78 = arith.divf %74, %77 : vector<2x8x8xf32>
    "tpu.trace_start"() <{level = 10 : i32, message = "bqk,bkd->bqd"}> : () -> ()
    %cst_32 = arith.constant dense<0.000000e+00> : vector<2x8x16xf32>
    %79 = tpu.matmul %78, %64, %cst_32 {dimension_numbers = #tpu.dot_dimension_numbers<[2], [1], [1], [2], [0, 0, 0, 1, 1, 2], [0], [0]>} : vector<2x8x8xf32>, vector<2x8x16xf32>, vector<2x8x16xf32> -> vector<2x8x16xf32>
    "tpu.trace_stop"() : () -> ()
    %80 = vector.shape_cast %79 : vector<2x8x16xf32> to vector<16x16xf32>
    %81 = vector.extract_strided_slice %34 {offsets = [16, 0], sizes = [16, 32], strides = [1, 1]} : vector<32x32xf32> to vector<16x32xf32>
    %cst_33 = arith.constant dense<0.000000e+00> : vector<16x32xf32>
    %82 = tpu.matmul %80, %81, %cst_33 {dimension_numbers = #tpu.dot_dimension_numbers<[1], [0], [0], [1], [0, 0, 1, 1], [], []>} : vector<16x16xf32>, vector<16x32xf32>, vector<16x32xf32> -> vector<16x32xf32>
    %83 = arith.addf %58, %82 : vector<16x32xf32>
    %c0_34 = arith.constant 0 : index
    %c0_35 = arith.constant 0 : index
    %c0_36 = arith.constant 0 : index
    %84 = vector.load %arg9[%c0_34, %c0_35, %c0_36] : memref<2x1x32xf32, #tpu.memory_space<vmem>>, vector<1x1x32xf32>
    %85 = vector.shape_cast %84 : vector<1x1x32xf32> to vector<1x32xf32>
    %86 = vector.broadcast %85 : vector<1x32xf32> to vector<16x32xf32>
    %87 = arith.addf %83, %86 : vector<16x32xf32>
    %88 = arith.addf %87, %24 : vector<16x32xf32>
    %c0_37 = arith.constant 0 : index
    %c0_38 = arith.constant 0 : index
    %c0_39 = arith.constant 0 : index
    %89 = vector.load %arg10[%c0_37, %c0_38, %c0_39] : memref<2x1x32xf32, #tpu.memory_space<vmem>>, vector<1x1x32xf32>
    %90 = vector.shape_cast %89 : vector<1x1x32xf32> to vector<1x32xf32>
    %c0_40 = arith.constant 0 : index
    %c0_41 = arith.constant 0 : index
    %c0_42 = arith.constant 0 : index
    %91 = vector.load %arg11[%c0_40, %c0_41, %c0_42] : memref<2x1x32xf32, #tpu.memory_space<vmem>>, vector<1x1x32xf32>
    %92 = vector.shape_cast %91 : vector<1x1x32xf32> to vector<1x32xf32>
    %cst_43 = arith.constant dense<0.000000e+00> : vector<16xf32>
    %93 = vector.multi_reduction <add>, %88, %cst_43 [1] : vector<16x32xf32> to vector<16xf32>
    %94 = vector.shape_cast %93 : vector<16xf32> to vector<16x1xf32>
    %cst_44 = arith.constant 3.200000e+01 : f32
    %95 = vector.broadcast %cst_44 : f32 to vector<16x1xf32>
    %96 = arith.divf %94, %95 : vector<16x1xf32>
    %97 = vector.broadcast %96 : vector<16x1xf32> to vector<16x32xf32>
    %98 = arith.subf %88, %97 : vector<16x32xf32>
    %99 = arith.mulf %98, %98 : vector<16x32xf32>
    %cst_45 = arith.constant dense<0.000000e+00> : vector<16xf32>
    %100 = vector.multi_reduction <add>, %99, %cst_45 [1] : vector<16x32xf32> to vector<16xf32>
    %101 = vector.shape_cast %100 : vector<16xf32> to vector<16x1xf32>
    %cst_46 = arith.constant 3.200000e+01 : f32
    %102 = vector.broadcast %cst_46 : f32 to vector<16x1xf32>
    %103 = arith.divf %101, %102 : vector<16x1xf32>
    %104 = vector.broadcast %96 : vector<16x1xf32> to vector<16x32xf32>
    %105 = arith.subf %88, %104 : vector<16x32xf32>
    %cst_47 = arith.constant 9.99999996E-13 : f32
    %106 = vector.broadcast %cst_47 : f32 to vector<16x1xf32>
    %107 = arith.addf %103, %106 : vector<16x1xf32>
    %108 = math.rsqrt %107 : vector<16x1xf32>
    %109 = vector.broadcast %108 : vector<16x1xf32> to vector<16x32xf32>
    %110 = arith.mulf %105, %109 : vector<16x32xf32>
    %111 = vector.broadcast %90 : vector<1x32xf32> to vector<16x32xf32>
    %112 = arith.mulf %110, %111 : vector<16x32xf32>
    %113 = vector.broadcast %92 : vector<1x32xf32> to vector<16x32xf32>
    %114 = arith.addf %112, %113 : vector<16x32xf32>
    %c0_48 = arith.constant 0 : index
    %c0_49 = arith.constant 0 : index
    %c0_50 = arith.constant 0 : index
    %115 = vector.load %arg12[%c0_48, %c0_49, %c0_50] : memref<2x32x64xf32, #tpu.memory_space<vmem>>, vector<1x32x64xf32>
    %116 = vector.shape_cast %115 : vector<1x32x64xf32> to vector<32x64xf32>
    %cst_51 = arith.constant dense<0.000000e+00> : vector<16x64xf32>
    %117 = tpu.matmul %114, %116, %cst_51 {dimension_numbers = #tpu.dot_dimension_numbers<[1], [0], [0], [1], [0, 0, 1, 1], [], []>} : vector<16x32xf32>, vector<32x64xf32>, vector<16x64xf32> -> vector<16x64xf32>
    %c0_52 = arith.constant 0 : index
    %c0_53 = arith.constant 0 : index
    %c0_54 = arith.constant 0 : index
    %118 = vector.load %arg13[%c0_52, %c0_53, %c0_54] : memref<2x1x64xf32, #tpu.memory_space<vmem>>, vector<1x1x64xf32>
    %119 = vector.shape_cast %118 : vector<1x1x64xf32> to vector<1x64xf32>
    %120 = vector.broadcast %119 : vector<1x64xf32> to vector<16x64xf32>
    %121 = arith.addf %117, %120 : vector<16x64xf32>
    %122 = arith.mulf %121, %121 : vector<16x64xf32>
    %123 = arith.mulf %121, %122 : vector<16x64xf32>
    %cst_55 = arith.constant 4.471500e-02 : f32
    %124 = vector.broadcast %cst_55 : f32 to vector<16x64xf32>
    %125 = arith.mulf %124, %123 : vector<16x64xf32>
    %126 = arith.addf %121, %125 : vector<16x64xf32>
    %cst_56 = arith.constant 0.797884583 : f32
    %127 = vector.broadcast %cst_56 : f32 to vector<16x64xf32>
    %128 = arith.mulf %127, %126 : vector<16x64xf32>
    %129 = math.tanh %128 : vector<16x64xf32>
    %cst_57 = arith.constant 1.000000e+00 : f32
    %130 = vector.broadcast %cst_57 : f32 to vector<16x64xf32>
    %131 = arith.addf %130, %129 : vector<16x64xf32>
    %cst_58 = arith.constant 5.000000e-01 : f32
    %132 = vector.broadcast %cst_58 : f32 to vector<16x64xf32>
    %133 = arith.mulf %132, %131 : vector<16x64xf32>
    %134 = arith.mulf %121, %133 : vector<16x64xf32>
    %c0_59 = arith.constant 0 : index
    %c0_60 = arith.constant 0 : index
    %c0_61 = arith.constant 0 : index
    %135 = vector.load %arg14[%c0_59, %c0_60, %c0_61] : memref<2x64x32xf32, #tpu.memory_space<vmem>>, vector<1x64x32xf32>
    %136 = vector.shape_cast %135 : vector<1x64x32xf32> to vector<64x32xf32>
    %cst_62 = arith.constant dense<0.000000e+00> : vector<16x32xf32>
    %137 = tpu.matmul %134, %136, %cst_62 {dimension_numbers = #tpu.dot_dimension_numbers<[1], [0], [0], [1], [0, 0, 1, 1], [], []>} : vector<16x64xf32>, vector<64x32xf32>, vector<16x32xf32> -> vector<16x32xf32>
    %c0_63 = arith.constant 0 : index
    %c0_64 = arith.constant 0 : index
    %c0_65 = arith.constant 0 : index
    %138 = vector.load %arg15[%c0_63, %c0_64, %c0_65] : memref<2x1x32xf32, #tpu.memory_space<vmem>>, vector<1x1x32xf32>
    %139 = vector.shape_cast %138 : vector<1x1x32xf32> to vector<1x32xf32>
    %140 = vector.broadcast %139 : vector<1x32xf32> to vector<16x32xf32>
    %141 = arith.addf %137, %140 : vector<16x32xf32>
    %142 = arith.addf %141, %114 : vector<16x32xf32>
    %c0_66 = arith.constant 0 : index
    %c0_67 = arith.constant 0 : index
    %c0_68 = arith.constant 0 : index
    %143 = vector.load %arg16[%c0_66, %c0_67, %c0_68] : memref<2x1x32xf32, #tpu.memory_space<vmem>>, vector<1x1x32xf32>
    %144 = vector.shape_cast %143 : vector<1x1x32xf32> to vector<1x32xf32>
    %c0_69 = arith.constant 0 : index
    %c0_70 = arith.constant 0 : index
    %c0_71 = arith.constant 0 : index
    %145 = vector.load %arg17[%c0_69, %c0_70, %c0_71] : memref<2x1x32xf32, #tpu.memory_space<vmem>>, vector<1x1x32xf32>
    %146 = vector.shape_cast %145 : vector<1x1x32xf32> to vector<1x32xf32>
    %cst_72 = arith.constant dense<0.000000e+00> : vector<16xf32>
    %147 = vector.multi_reduction <add>, %142, %cst_72 [1] : vector<16x32xf32> to vector<16xf32>
    %148 = vector.shape_cast %147 : vector<16xf32> to vector<16x1xf32>
    %cst_73 = arith.constant 3.200000e+01 : f32
    %149 = vector.broadcast %cst_73 : f32 to vector<16x1xf32>
    %150 = arith.divf %148, %149 : vector<16x1xf32>
    %151 = vector.broadcast %150 : vector<16x1xf32> to vector<16x32xf32>
    %152 = arith.subf %142, %151 : vector<16x32xf32>
    %153 = arith.mulf %152, %152 : vector<16x32xf32>
    %cst_74 = arith.constant dense<0.000000e+00> : vector<16xf32>
    %154 = vector.multi_reduction <add>, %153, %cst_74 [1] : vector<16x32xf32> to vector<16xf32>
    %155 = vector.shape_cast %154 : vector<16xf32> to vector<16x1xf32>
    %cst_75 = arith.constant 3.200000e+01 : f32
    %156 = vector.broadcast %cst_75 : f32 to vector<16x1xf32>
    %157 = arith.divf %155, %156 : vector<16x1xf32>
    %158 = vector.broadcast %150 : vector<16x1xf32> to vector<16x32xf32>
    %159 = arith.subf %142, %158 : vector<16x32xf32>
    %cst_76 = arith.constant 9.99999996E-13 : f32
    %160 = vector.broadcast %cst_76 : f32 to vector<16x1xf32>
    %161 = arith.addf %157, %160 : vector<16x1xf32>
    %162 = math.rsqrt %161 : vector<16x1xf32>
    %163 = vector.broadcast %162 : vector<16x1xf32> to vector<16x32xf32>
    %164 = arith.mulf %159, %163 : vector<16x32xf32>
    %165 = vector.broadcast %144 : vector<1x32xf32> to vector<16x32xf32>
    %166 = arith.mulf %164, %165 : vector<16x32xf32>
    %167 = vector.broadcast %146 : vector<1x32xf32> to vector<16x32xf32>
    %168 = arith.addf %166, %167 : vector<16x32xf32>
    %c1 = arith.constant 1 : index
    %c0_77 = arith.constant 0 : index
    %c0_78 = arith.constant 0 : index
    %169 = vector.load %arg6[%c1, %c0_77, %c0_78] : memref<2x32x96xf32, #tpu.memory_space<vmem>>, vector<1x32x96xf32>
    %170 = vector.shape_cast %169 : vector<1x32x96xf32> to vector<32x96xf32>
    %cst_79 = arith.constant dense<0.000000e+00> : vector<16x96xf32>
    %171 = tpu.matmul %168, %170, %cst_79 {dimension_numbers = #tpu.dot_dimension_numbers<[1], [0], [0], [1], [0, 0, 1, 1], [], []>} : vector<16x32xf32>, vector<32x96xf32>, vector<16x96xf32> -> vector<16x96xf32>
    %c1_80 = arith.constant 1 : index
    %c0_81 = arith.constant 0 : index
    %c0_82 = arith.constant 0 : index
    %172 = vector.load %arg7[%c1_80, %c0_81, %c0_82] : memref<2x1x96xf32, #tpu.memory_space<vmem>>, vector<1x1x96xf32>
    %173 = vector.shape_cast %172 : vector<1x1x96xf32> to vector<1x96xf32>
    %174 = vector.broadcast %173 : vector<1x96xf32> to vector<16x96xf32>
    %175 = arith.addf %171, %174 : vector<16x96xf32>
    %c1_83 = arith.constant 1 : index
    %c0_84 = arith.constant 0 : index
    %c0_85 = arith.constant 0 : index
    %176 = vector.load %arg8[%c1_83, %c0_84, %c0_85] : memref<2x32x32xf32, #tpu.memory_space<vmem>>, vector<1x32x32xf32>
    %177 = vector.shape_cast %176 : vector<1x32x32xf32> to vector<32x32xf32>
    %178 = vector.extract_strided_slice %175 {offsets = [0, 0], sizes = [16, 16], strides = [1, 1]} : vector<16x96xf32> to vector<16x16xf32>
    %179 = vector.shape_cast %178 : vector<16x16xf32> to vector<2x8x16xf32>
    %180 = vector.extract_strided_slice %175 {offsets = [0, 32], sizes = [16, 16], strides = [1, 1]} : vector<16x96xf32> to vector<16x16xf32>
    %181 = vector.shape_cast %180 : vector<16x16xf32> to vector<2x8x16xf32>
    %182 = vector.extract_strided_slice %175 {offsets = [0, 64], sizes = [16, 16], strides = [1, 1]} : vector<16x96xf32> to vector<16x16xf32>
    %183 = vector.shape_cast %182 : vector<16x16xf32> to vector<2x8x16xf32>
    "tpu.trace_start"() <{level = 10 : i32, message = "bqd,bkd->bqk"}> : () -> ()
    %cst_86 = arith.constant dense<0.000000e+00> : vector<2x8x8xf32>
    %184 = tpu.matmul %179, %181, %cst_86 {dimension_numbers = #tpu.dot_dimension_numbers<[2], [2], [1], [1], [0, 0, 0, 1, 1, 1], [0], [0]>} : vector<2x8x16xf32>, vector<2x8x16xf32>, vector<2x8x8xf32> -> vector<2x8x8xf32>
    "tpu.trace_stop"() : () -> ()
    %cst_87 = arith.constant 2.500000e-01 : f32
    %185 = vector.broadcast %cst_87 : f32 to vector<2x8x8xf32>
    %186 = arith.mulf %184, %185 : vector<2x8x8xf32>
    %187 = vector.broadcast %25 : vector<2x1x8xf32> to vector<2x8x8xf32>
    %188 = arith.addf %186, %187 : vector<2x8x8xf32>
    %cst_88 = arith.constant dense<0xFF800000> : vector<2x8xf32>
    %189 = vector.multi_reduction <maximumf>, %188, %cst_88 [2] : vector<2x8x8xf32> to vector<2x8xf32>
    %190 = vector.shape_cast %189 : vector<2x8xf32> to vector<2x8x1xf32>
    %191 = vector.broadcast %190 : vector<2x8x1xf32> to vector<2x8x8xf32>
    %192 = arith.subf %188, %191 : vector<2x8x8xf32>
    %193 = math.exp %192 : vector<2x8x8xf32>
    %cst_89 = arith.constant dense<0.000000e+00> : vector<2x8xf32>
    %194 = vector.multi_reduction <add>, %193, %cst_89 [2] : vector<2x8x8xf32> to vector<2x8xf32>
    %195 = vector.shape_cast %194 : vector<2x8xf32> to vector<2x8x1xf32>
    %196 = vector.broadcast %195 : vector<2x8x1xf32> to vector<2x8x8xf32>
    %197 = arith.divf %193, %196 : vector<2x8x8xf32>
    "tpu.trace_start"() <{level = 10 : i32, message = "bqk,bkd->bqd"}> : () -> ()
    %cst_90 = arith.constant dense<0.000000e+00> : vector<2x8x16xf32>
    %198 = tpu.matmul %197, %183, %cst_90 {dimension_numbers = #tpu.dot_dimension_numbers<[2], [1], [1], [2], [0, 0, 0, 1, 1, 2], [0], [0]>} : vector<2x8x8xf32>, vector<2x8x16xf32>, vector<2x8x16xf32> -> vector<2x8x16xf32>
    "tpu.trace_stop"() : () -> ()
    %199 = vector.shape_cast %198 : vector<2x8x16xf32> to vector<16x16xf32>
    %200 = vector.extract_strided_slice %177 {offsets = [0, 0], sizes = [16, 32], strides = [1, 1]} : vector<32x32xf32> to vector<16x32xf32>
    %cst_91 = arith.constant dense<0.000000e+00> : vector<16x32xf32>
    %201 = tpu.matmul %199, %200, %cst_91 {dimension_numbers = #tpu.dot_dimension_numbers<[1], [0], [0], [1], [0, 0, 1, 1], [], []>} : vector<16x16xf32>, vector<16x32xf32>, vector<16x32xf32> -> vector<16x32xf32>
    %202 = vector.extract_strided_slice %175 {offsets = [0, 16], sizes = [16, 16], strides = [1, 1]} : vector<16x96xf32> to vector<16x16xf32>
    %203 = vector.shape_cast %202 : vector<16x16xf32> to vector<2x8x16xf32>
    %204 = vector.extract_strided_slice %175 {offsets = [0, 48], sizes = [16, 16], strides = [1, 1]} : vector<16x96xf32> to vector<16x16xf32>
    %205 = vector.shape_cast %204 : vector<16x16xf32> to vector<2x8x16xf32>
    %206 = vector.extract_strided_slice %175 {offsets = [0, 80], sizes = [16, 16], strides = [1, 1]} : vector<16x96xf32> to vector<16x16xf32>
    %207 = vector.shape_cast %206 : vector<16x16xf32> to vector<2x8x16xf32>
    "tpu.trace_start"() <{level = 10 : i32, message = "bqd,bkd->bqk"}> : () -> ()
    %cst_92 = arith.constant dense<0.000000e+00> : vector<2x8x8xf32>
    %208 = tpu.matmul %203, %205, %cst_92 {dimension_numbers = #tpu.dot_dimension_numbers<[2], [2], [1], [1], [0, 0, 0, 1, 1, 1], [0], [0]>} : vector<2x8x16xf32>, vector<2x8x16xf32>, vector<2x8x8xf32> -> vector<2x8x8xf32>
    "tpu.trace_stop"() : () -> ()
    %cst_93 = arith.constant 2.500000e-01 : f32
    %209 = vector.broadcast %cst_93 : f32 to vector<2x8x8xf32>
    %210 = arith.mulf %208, %209 : vector<2x8x8xf32>
    %211 = vector.broadcast %25 : vector<2x1x8xf32> to vector<2x8x8xf32>
    %212 = arith.addf %210, %211 : vector<2x8x8xf32>
    %cst_94 = arith.constant dense<0xFF800000> : vector<2x8xf32>
    %213 = vector.multi_reduction <maximumf>, %212, %cst_94 [2] : vector<2x8x8xf32> to vector<2x8xf32>
    %214 = vector.shape_cast %213 : vector<2x8xf32> to vector<2x8x1xf32>
    %215 = vector.broadcast %214 : vector<2x8x1xf32> to vector<2x8x8xf32>
    %216 = arith.subf %212, %215 : vector<2x8x8xf32>
    %217 = math.exp %216 : vector<2x8x8xf32>
    %cst_95 = arith.constant dense<0.000000e+00> : vector<2x8xf32>
    %218 = vector.multi_reduction <add>, %217, %cst_95 [2] : vector<2x8x8xf32> to vector<2x8xf32>
    %219 = vector.shape_cast %218 : vector<2x8xf32> to vector<2x8x1xf32>
    %220 = vector.broadcast %219 : vector<2x8x1xf32> to vector<2x8x8xf32>
    %221 = arith.divf %217, %220 : vector<2x8x8xf32>
    "tpu.trace_start"() <{level = 10 : i32, message = "bqk,bkd->bqd"}> : () -> ()
    %cst_96 = arith.constant dense<0.000000e+00> : vector<2x8x16xf32>
    %222 = tpu.matmul %221, %207, %cst_96 {dimension_numbers = #tpu.dot_dimension_numbers<[2], [1], [1], [2], [0, 0, 0, 1, 1, 2], [0], [0]>} : vector<2x8x8xf32>, vector<2x8x16xf32>, vector<2x8x16xf32> -> vector<2x8x16xf32>
    "tpu.trace_stop"() : () -> ()
    %223 = vector.shape_cast %222 : vector<2x8x16xf32> to vector<16x16xf32>
    %224 = vector.extract_strided_slice %177 {offsets = [16, 0], sizes = [16, 32], strides = [1, 1]} : vector<32x32xf32> to vector<16x32xf32>
    %cst_97 = arith.constant dense<0.000000e+00> : vector<16x32xf32>
    %225 = tpu.matmul %223, %224, %cst_97 {dimension_numbers = #tpu.dot_dimension_numbers<[1], [0], [0], [1], [0, 0, 1, 1], [], []>} : vector<16x16xf32>, vector<16x32xf32>, vector<16x32xf32> -> vector<16x32xf32>
    %226 = arith.addf %201, %225 : vector<16x32xf32>
    %c1_98 = arith.constant 1 : index
    %c0_99 = arith.constant 0 : index
    %c0_100 = arith.constant 0 : index
    %227 = vector.load %arg9[%c1_98, %c0_99, %c0_100] : memref<2x1x32xf32, #tpu.memory_space<vmem>>, vector<1x1x32xf32>
    %228 = vector.shape_cast %227 : vector<1x1x32xf32> to vector<1x32xf32>
    %229 = vector.broadcast %228 : vector<1x32xf32> to vector<16x32xf32>
    %230 = arith.addf %226, %229 : vector<16x32xf32>
    %231 = arith.addf %230, %168 : vector<16x32xf32>
    %c1_101 = arith.constant 1 : index
    %c0_102 = arith.constant 0 : index
    %c0_103 = arith.constant 0 : index
    %232 = vector.load %arg10[%c1_101, %c0_102, %c0_103] : memref<2x1x32xf32, #tpu.memory_space<vmem>>, vector<1x1x32xf32>
    %233 = vector.shape_cast %232 : vector<1x1x32xf32> to vector<1x32xf32>
    %c1_104 = arith.constant 1 : index
    %c0_105 = arith.constant 0 : index
    %c0_106 = arith.constant 0 : index
    %234 = vector.load %arg11[%c1_104, %c0_105, %c0_106] : memref<2x1x32xf32, #tpu.memory_space<vmem>>, vector<1x1x32xf32>
    %235 = vector.shape_cast %234 : vector<1x1x32xf32> to vector<1x32xf32>
    %cst_107 = arith.constant dense<0.000000e+00> : vector<16xf32>
    %236 = vector.multi_reduction <add>, %231, %cst_107 [1] : vector<16x32xf32> to vector<16xf32>
    %237 = vector.shape_cast %236 : vector<16xf32> to vector<16x1xf32>
    %cst_108 = arith.constant 3.200000e+01 : f32
    %238 = vector.broadcast %cst_108 : f32 to vector<16x1xf32>
    %239 = arith.divf %237, %238 : vector<16x1xf32>
    %240 = vector.broadcast %239 : vector<16x1xf32> to vector<16x32xf32>
    %241 = arith.subf %231, %240 : vector<16x32xf32>
    %242 = arith.mulf %241, %241 : vector<16x32xf32>
    %cst_109 = arith.constant dense<0.000000e+00> : vector<16xf32>
    %243 = vector.multi_reduction <add>, %242, %cst_109 [1] : vector<16x32xf32> to vector<16xf32>
    %244 = vector.shape_cast %243 : vector<16xf32> to vector<16x1xf32>
    %cst_110 = arith.constant 3.200000e+01 : f32
    %245 = vector.broadcast %cst_110 : f32 to vector<16x1xf32>
    %246 = arith.divf %244, %245 : vector<16x1xf32>
    %247 = vector.broadcast %239 : vector<16x1xf32> to vector<16x32xf32>
    %248 = arith.subf %231, %247 : vector<16x32xf32>
    %cst_111 = arith.constant 9.99999996E-13 : f32
    %249 = vector.broadcast %cst_111 : f32 to vector<16x1xf32>
    %250 = arith.addf %246, %249 : vector<16x1xf32>
    %251 = math.rsqrt %250 : vector<16x1xf32>
    %252 = vector.broadcast %251 : vector<16x1xf32> to vector<16x32xf32>
    %253 = arith.mulf %248, %252 : vector<16x32xf32>
    %254 = vector.broadcast %233 : vector<1x32xf32> to vector<16x32xf32>
    %255 = arith.mulf %253, %254 : vector<16x32xf32>
    %256 = vector.broadcast %235 : vector<1x32xf32> to vector<16x32xf32>
    %257 = arith.addf %255, %256 : vector<16x32xf32>
    %c1_112 = arith.constant 1 : index
    %c0_113 = arith.constant 0 : index
    %c0_114 = arith.constant 0 : index
    %258 = vector.load %arg12[%c1_112, %c0_113, %c0_114] : memref<2x32x64xf32, #tpu.memory_space<vmem>>, vector<1x32x64xf32>
    %259 = vector.shape_cast %258 : vector<1x32x64xf32> to vector<32x64xf32>
    %cst_115 = arith.constant dense<0.000000e+00> : vector<16x64xf32>
    %260 = tpu.matmul %257, %259, %cst_115 {dimension_numbers = #tpu.dot_dimension_numbers<[1], [0], [0], [1], [0, 0, 1, 1], [], []>} : vector<16x32xf32>, vector<32x64xf32>, vector<16x64xf32> -> vector<16x64xf32>
    %c1_116 = arith.constant 1 : index
    %c0_117 = arith.constant 0 : index
    %c0_118 = arith.constant 0 : index
    %261 = vector.load %arg13[%c1_116, %c0_117, %c0_118] : memref<2x1x64xf32, #tpu.memory_space<vmem>>, vector<1x1x64xf32>
    %262 = vector.shape_cast %261 : vector<1x1x64xf32> to vector<1x64xf32>
    %263 = vector.broadcast %262 : vector<1x64xf32> to vector<16x64xf32>
    %264 = arith.addf %260, %263 : vector<16x64xf32>
    %265 = arith.mulf %264, %264 : vector<16x64xf32>
    %266 = arith.mulf %264, %265 : vector<16x64xf32>
    %cst_119 = arith.constant 4.471500e-02 : f32
    %267 = vector.broadcast %cst_119 : f32 to vector<16x64xf32>
    %268 = arith.mulf %267, %266 : vector<16x64xf32>
    %269 = arith.addf %264, %268 : vector<16x64xf32>
    %cst_120 = arith.constant 0.797884583 : f32
    %270 = vector.broadcast %cst_120 : f32 to vector<16x64xf32>
    %271 = arith.mulf %270, %269 : vector<16x64xf32>
    %272 = math.tanh %271 : vector<16x64xf32>
    %cst_121 = arith.constant 1.000000e+00 : f32
    %273 = vector.broadcast %cst_121 : f32 to vector<16x64xf32>
    %274 = arith.addf %273, %272 : vector<16x64xf32>
    %cst_122 = arith.constant 5.000000e-01 : f32
    %275 = vector.broadcast %cst_122 : f32 to vector<16x64xf32>
    %276 = arith.mulf %275, %274 : vector<16x64xf32>
    %277 = arith.mulf %264, %276 : vector<16x64xf32>
    %c1_123 = arith.constant 1 : index
    %c0_124 = arith.constant 0 : index
    %c0_125 = arith.constant 0 : index
    %278 = vector.load %arg14[%c1_123, %c0_124, %c0_125] : memref<2x64x32xf32, #tpu.memory_space<vmem>>, vector<1x64x32xf32>
    %279 = vector.shape_cast %278 : vector<1x64x32xf32> to vector<64x32xf32>
    %cst_126 = arith.constant dense<0.000000e+00> : vector<16x32xf32>
    %280 = tpu.matmul %277, %279, %cst_126 {dimension_numbers = #tpu.dot_dimension_numbers<[1], [0], [0], [1], [0, 0, 1, 1], [], []>} : vector<16x64xf32>, vector<64x32xf32>, vector<16x32xf32> -> vector<16x32xf32>
    %c1_127 = arith.constant 1 : index
    %c0_128 = arith.constant 0 : index
    %c0_129 = arith.constant 0 : index
    %281 = vector.load %arg15[%c1_127, %c0_128, %c0_129] : memref<2x1x32xf32, #tpu.memory_space<vmem>>, vector<1x1x32xf32>
    %282 = vector.shape_cast %281 : vector<1x1x32xf32> to vector<1x32xf32>
    %283 = vector.broadcast %282 : vector<1x32xf32> to vector<16x32xf32>
    %284 = arith.addf %280, %283 : vector<16x32xf32>
    %285 = arith.addf %284, %257 : vector<16x32xf32>
    %c1_130 = arith.constant 1 : index
    %c0_131 = arith.constant 0 : index
    %c0_132 = arith.constant 0 : index
    %286 = vector.load %arg16[%c1_130, %c0_131, %c0_132] : memref<2x1x32xf32, #tpu.memory_space<vmem>>, vector<1x1x32xf32>
    %287 = vector.shape_cast %286 : vector<1x1x32xf32> to vector<1x32xf32>
    %c1_133 = arith.constant 1 : index
    %c0_134 = arith.constant 0 : index
    %c0_135 = arith.constant 0 : index
    %288 = vector.load %arg17[%c1_133, %c0_134, %c0_135] : memref<2x1x32xf32, #tpu.memory_space<vmem>>, vector<1x1x32xf32>
    %289 = vector.shape_cast %288 : vector<1x1x32xf32> to vector<1x32xf32>
    %cst_136 = arith.constant dense<0.000000e+00> : vector<16xf32>
    %290 = vector.multi_reduction <add>, %285, %cst_136 [1] : vector<16x32xf32> to vector<16xf32>
    %291 = vector.shape_cast %290 : vector<16xf32> to vector<16x1xf32>
    %cst_137 = arith.constant 3.200000e+01 : f32
    %292 = vector.broadcast %cst_137 : f32 to vector<16x1xf32>
    %293 = arith.divf %291, %292 : vector<16x1xf32>
    %294 = vector.broadcast %293 : vector<16x1xf32> to vector<16x32xf32>
    %295 = arith.subf %285, %294 : vector<16x32xf32>
    %296 = arith.mulf %295, %295 : vector<16x32xf32>
    %cst_138 = arith.constant dense<0.000000e+00> : vector<16xf32>
    %297 = vector.multi_reduction <add>, %296, %cst_138 [1] : vector<16x32xf32> to vector<16xf32>
    %298 = vector.shape_cast %297 : vector<16xf32> to vector<16x1xf32>
    %cst_139 = arith.constant 3.200000e+01 : f32
    %299 = vector.broadcast %cst_139 : f32 to vector<16x1xf32>
    %300 = arith.divf %298, %299 : vector<16x1xf32>
    %301 = vector.broadcast %293 : vector<16x1xf32> to vector<16x32xf32>
    %302 = arith.subf %285, %301 : vector<16x32xf32>
    %cst_140 = arith.constant 9.99999996E-13 : f32
    %303 = vector.broadcast %cst_140 : f32 to vector<16x1xf32>
    %304 = arith.addf %300, %303 : vector<16x1xf32>
    %305 = math.rsqrt %304 : vector<16x1xf32>
    %306 = vector.broadcast %305 : vector<16x1xf32> to vector<16x32xf32>
    %307 = arith.mulf %302, %306 : vector<16x32xf32>
    %308 = vector.broadcast %287 : vector<1x32xf32> to vector<16x32xf32>
    %309 = arith.mulf %307, %308 : vector<16x32xf32>
    %310 = vector.broadcast %289 : vector<1x32xf32> to vector<16x32xf32>
    %311 = arith.addf %309, %310 : vector<16x32xf32>
    %312 = vector.shape_cast %311 : vector<16x32xf32> to vector<2x8x32xf32>
    %313 = vector.extract_strided_slice %312 {offsets = [0, 0, 0], sizes = [2, 1, 32], strides = [1, 1, 1]} : vector<2x8x32xf32> to vector<2x1x32xf32>
    %314 = vector.shape_cast %313 : vector<2x1x32xf32> to vector<2x32xf32>
    %c0_141 = arith.constant 0 : index
    %c0_142 = arith.constant 0 : index
    %315 = vector.load %arg18[%c0_141, %c0_142] : memref<32x32xf32, #tpu.memory_space<vmem>>, vector<32x32xf32>
    %cst_143 = arith.constant dense<0.000000e+00> : vector<2x32xf32>
    %316 = tpu.matmul %314, %315, %cst_143 {dimension_numbers = #tpu.dot_dimension_numbers<[1], [0], [0], [1], [0, 0, 1, 1], [], []>} : vector<2x32xf32>, vector<32x32xf32>, vector<2x32xf32> -> vector<2x32xf32>
    %c0_144 = arith.constant 0 : index
    %c0_145 = arith.constant 0 : index
    %317 = vector.load %arg19[%c0_144, %c0_145] : memref<1x32xf32, #tpu.memory_space<vmem>>, vector<1x32xf32>
    %318 = vector.broadcast %317 : vector<1x32xf32> to vector<2x32xf32>
    %319 = arith.addf %316, %318 : vector<2x32xf32>
    %320 = math.tanh %319 : vector<2x32xf32>
    %c0_146 = arith.constant 0 : index
    %c0_147 = arith.constant 0 : index
    %321 = vector.load %arg20[%c0_146, %c0_147] : memref<32x128xf32, #tpu.memory_space<vmem>>, vector<32x128xf32>
    %cst_148 = arith.constant dense<0.000000e+00> : vector<2x128xf32>
    %322 = tpu.matmul %320, %321, %cst_148 {dimension_numbers = #tpu.dot_dimension_numbers<[1], [0], [0], [1], [0, 0, 1, 1], [], []>} : vector<2x32xf32>, vector<32x128xf32>, vector<2x128xf32> -> vector<2x128xf32>
    %c0_149 = arith.constant 0 : index
    %c0_150 = arith.constant 0 : index
    %323 = vector.load %arg2[%c0_149, %c0_150] : memref<2x1xf32, #tpu.memory_space<vmem>>, vector<2x1xf32>
    %c0_151 = arith.constant 0 : index
    %c0_152 = arith.constant 0 : index
    %324 = vector.load %arg21[%c0_151, %c0_152] : memref<1x128xf32, #tpu.memory_space<vmem>>, vector<1x128xf32>
    %325 = vector.broadcast %323 : vector<2x1xf32> to vector<2x128xf32>
    %326 = vector.broadcast %324 : vector<1x128xf32> to vector<2x128xf32>
    %327 = arith.mulf %325, %326 : vector<2x128xf32>
    %328 = arith.addf %322, %327 : vector<2x128xf32>
    %c0_153 = arith.constant 0 : index
    %c0_154 = arith.constant 0 : index
    %329 = vector.load %arg22[%c0_153, %c0_154] : memref<1x128xf32, #tpu.memory_space<vmem>>, vector<1x128xf32>
    %330 = vector.broadcast %329 : vector<1x128xf32> to vector<2x128xf32>
    %331 = arith.addf %328, %330 : vector<2x128xf32>
    %cst_155 = arith.constant 0.000000e+00 : f32
    %332 = vector.broadcast %cst_155 : f32 to vector<2x128xf32>
    %333 = arith.maximumf %331, %332 : vector<2x128xf32>
    %c0_156 = arith.constant 0 : index
    %c0_157 = arith.constant 0 : index
    %334 = vector.load %arg23[%c0_156, %c0_157] : memref<128x3xf32, #tpu.memory_space<vmem>>, vector<128x3xf32>
    %cst_158 = arith.constant dense<0.000000e+00> : vector<2x3xf32>
    %335 = tpu.matmul %333, %334, %cst_158 {dimension_numbers = #tpu.dot_dimension_numbers<[1], [0], [0], [1], [0, 0, 1, 1], [], []>} : vector<2x128xf32>, vector<128x3xf32>, vector<2x3xf32> -> vector<2x3xf32>
    %c0_159 = arith.constant 0 : index
    %c0_160 = arith.constant 0 : index
    %336 = vector.load %arg24[%c0_159, %c0_160] : memref<1x3xf32, #tpu.memory_space<vmem>>, vector<1x3xf32>
    %337 = vector.broadcast %336 : vector<1x3xf32> to vector<2x3xf32>
    %338 = arith.addf %335, %337 : vector<2x3xf32>
    %c0_161 = arith.constant 0 : index
    %c0_162 = arith.constant 0 : index
    %339 = vector.load %arg25[%c0_161, %c0_162] : memref<2x3xf32, #tpu.memory_space<vmem>>, vector<2x3xf32>
    tpu.vector_store %arg25[%c0_161, %c0_162], %338 {strides = array<i32>} : memref<2x3xf32, #tpu.memory_space<vmem>>, vector<2x3xf32>,
    %cst_163 = arith.constant dense<0xFF800000> : vector<2xf32>
    %340 = vector.multi_reduction <maximumf>, %338, %cst_163 [1] : vector<2x3xf32> to vector<2xf32>
    %341 = vector.shape_cast %340 : vector<2xf32> to vector<2x1xf32>
    %342 = vector.broadcast %341 : vector<2x1xf32> to vector<2x3xf32>
    %343 = arith.subf %338, %342 : vector<2x3xf32>
    %344 = math.exp %343 : vector<2x3xf32>
    %cst_164 = arith.constant dense<0.000000e+00> : vector<2xf32>
    %345 = vector.multi_reduction <add>, %344, %cst_164 [1] : vector<2x3xf32> to vector<2xf32>
    %346 = vector.shape_cast %345 : vector<2xf32> to vector<2x1xf32>
    %347 = math.log %346 : vector<2x1xf32>
    %348 = arith.addf %347, %341 : vector<2x1xf32>
    %349 = vector.broadcast %348 : vector<2x1xf32> to vector<2x3xf32>
    %350 = arith.subf %338, %349 : vector<2x3xf32>
    %c0_165 = arith.constant 0 : index
    %c0_166 = arith.constant 0 : index
    %351 = vector.load %arg3[%c0_165, %c0_166] : memref<2x3xf32, #tpu.memory_space<vmem>>, vector<2x3xf32>
    %352 = arith.mulf %351, %350 : vector<2x3xf32>
    %cst_167 = arith.constant dense<0.000000e+00> : vector<2xf32>
    %353 = vector.multi_reduction <add>, %352, %cst_167 [1] : vector<2x3xf32> to vector<2xf32>
    %354 = vector.shape_cast %353 : vector<2xf32> to vector<2x1xf32>
    %cst_168 = arith.constant 0.000000e+00 : f32
    %355 = vector.broadcast %cst_168 : f32 to vector<2x1xf32>
    %356 = arith.subf %355, %354 : vector<2x1xf32>
    %cst_169 = arith.constant dense<0.000000e+00> : vector<1xf32>
    %357 = vector.multi_reduction <add>, %356, %cst_169 [0] : vector<2x1xf32> to vector<1xf32>
    %358 = vector.shape_cast %357 : vector<1xf32> to vector<1x1xf32>
    %cst_170 = arith.constant 2.000000e+00 : f32
    %359 = vector.broadcast %cst_170 : f32 to vector<1x1xf32>
    %360 = arith.divf %358, %359 : vector<1x1xf32>
    %c0_171 = arith.constant 0 : index
    %c0_172 = arith.constant 0 : index
    %361 = vector.load %arg26[%c0_171, %c0_172] : memref<1x1xf32, #tpu.memory_space<vmem>>, vector<1x1xf32>
    tpu.vector_store %arg26[%c0_171, %c0_172], %360 {strides = array<i32>} : memref<1x1xf32, #tpu.memory_space<vmem>>, vector<1x1xf32>,
    return
  }
}

</mosaic_0001>

<bundles_post_ra>
// kernel: tpu_custom_call.1
= control target key start
LH: loop header
LB: loop body
LE: loop exit
PB: predicated region body
PF: predicated region fallthrough
CT: control target
= control target key end

     0   :  { %s2514_s0 = inlined_call_operand.vmem [shape: f32[16,32], index: 0, kind: input, shape index: {}]   ;;  %s2515_s1 = inlined_call_operand.vmem [shape: f32[2,1,8], index: 1, kind: input, shape index: {}]   ;;  %s2516_s2 = inlined_call_operand.vmem [shape: f32[2,1], index: 2, kind: input, shape index: {}]   ;;  %s2517_s3 = inlined_call_operand.vmem [shape: f32[2,3], index: 3, kind: input, shape index: {}]   ;;  %s2518_s4 = inlined_call_operand.vmem [shape: f32[1,32], index: 4, kind: input, shape index: {}]   ;;  %s2519_s5 = inlined_call_operand.vmem [shape: f32[1,32], index: 5, kind: input, shape index: {}]   ;;  %s2520_s6 = inlined_call_operand.vmem [shape: f32[2,32,96], index: 6, kind: input, shape index: {}]   ;;  %s2521_s7 = inlined_call_operand.vmem [shape: f32[2,1,96], index: 7, kind: input, shape index: {}]   ;;  %s2522_s8 = inlined_call_operand.vmem [shape: f32[2,32,32], index: 8, kind: input, shape index: {}]   ;;  %s2523_s9 = inlined_call_operand.vmem [shape: f32[2,1,32], index: 9, kind: input, shape index: {}]   ;;  %s2524_s10 = inlined_call_operand.vmem [shape: f32[2,1,32], index: 10, kind: input, shape index: {}]   ;;  %s2525_s11 = inlined_call_operand.vmem [shape: f32[2,1,32], index: 11, kind: input, shape index: {}]   ;;  %s2526_s12 = inlined_call_operand.vmem [shape: f32[2,32,64], index: 12, kind: input, shape index: {}]   ;;  %s2527_s13 = inlined_call_operand.vmem [shape: f32[2,1,64], index: 13, kind: input, shape index: {}]   ;;  %s2528_s14 = inlined_call_operand.vmem [shape: f32[2,64,32], index: 14, kind: input, shape index: {}]   ;;  %s2529_s15 = inlined_call_operand.vmem [shape: f32[2,1,32], index: 15, kind: input, shape index: {}]   ;;  %s2530_s16 = inlined_call_operand.vmem [shape: f32[2,1,32], index: 16, kind: input, shape index: {}]   ;;  %s2531_s17 = inlined_call_operand.vmem [shape: f32[2,1,32], index: 17, kind: input, shape index: {}]   ;;  %s2532_s18 = inlined_call_operand.vmem [shape: f32[32,32], index: 18, kind: input, shape index: {}]   ;;  %s2533_s19 = inlined_call_operand.vmem [shape: f32[1,32], index: 19, kind: input, shape index: {}]   ;;  %s2534_s20 = inlined_call_operand.vmem [shape: f32[32,128], index: 20, kind: input, shape index: {}]   ;;  %s2535_s21 = inlined_call_operand.vmem [shape: f32[1,128], index: 21, kind: input, shape index: {}]   ;;  %s2536_s22 = inlined_call_operand.vmem [shape: f32[1,128], index: 22, kind: input, shape index: {}]   ;;  %s2537_s23 = inlined_call_operand.vmem [shape: f32[128,3], index: 23, kind: input, shape index: {}]   ;;  %s2538_s24 = inlined_call_operand.vmem [shape: f32[1,3], index: 24, kind: input, shape index: {}]   ;;  %s2539_s25 = inlined_call_operand.hbm [shape: f32[2,3], index: 25, kind: output, shape index: {0}]   ;;  %s2540_s26 = inlined_call_operand.hbm [shape: f32[1,1], index: 26, kind: output, shape index: {1}]  }
   0x1   :  { %2556 = sst [smem:[#allocation8_spill]] %s2514_s0 }
   0x2   :  { %2557 = sst [smem:[#allocation9_spill]] %s2515_s1 }
   0x3   :  { %2558 = sst [smem:[#allocation10_spill]] %s2516_s2 }
   0x4   :  { %2559 = sst [smem:[#allocation11_spill]] %s2517_s3 }
   0x5   :  { %2560 = sst [smem:[#allocation12_spill]] %s2518_s4 }
   0x6   :  { %2561 = sst [smem:[#allocation13_spill]] %s2519_s5 }
   0x7   :  { %2562 = sst [smem:[#allocation14_spill]] %s2520_s6 }
   0x8   :  { %2563 = sst [smem:[#allocation15_spill]] %s2521_s7 }
   0x9   :  { %2564 = sst [smem:[#allocation16_spill]] %s2522_s8 }
   0xa   :  { %2565 = sst [smem:[#allocation17_spill]] %s2523_s9 }
   0xb   :  { %2566 = sst [smem:[#allocation18_spill]] %s2524_s10 }
   0xc   :  { %32 = vsyncpa [#allocation3], 0  ;;  %s2567_s7 = sld [smem:[#allocation8_spill]]  ;;  %vm88_vm0 = vcmask 261120  }
  0x12   :  { %v84_v0 = vld [vmem:[%s2567_s7] sm:$0xff]  ;;  %v85_v1 = vld [vmem:[%s2567_s7 + $0x8] sm:$0xff] }
  0x13   :  { %v89_v2 = vsel %vm88_vm0, %v84_v0, 0.0  ;;  %v92_v3 = vsel %vm88_vm0, %v85_v1, 0.0 }
  0x14   :  { %90 = vadd.xlane.f32.xlu0 %v89_v2 }
  0x15   :  { %33 = vsyncpa [#allocation5], 0  ;;  %v1880_v4 = vmov 32.0   ;;  %s2568_s0 = sld [smem:[#allocation14_spill]]  ;;  %s2550_s30 = smov 80   ;;  %vm196_vm8 = vcmask 130048  }
  0x16   :  { %1758 = vrcp.f32 %v1880_v4  ;;  %s2569_s3 = sld [smem:[#allocation12_spill]]  ;;  %s2554_s2 = smov 96   ;;  %vm258_vm9 = vcmask 64512  }
  0x17   :  { %s2570_s8 = sld [smem:[#allocation13_spill]]  ;;  %s2552_s5 = smov 112  }
  0x18   :  { %s2571_s9 = sld [smem:[#allocation15_spill]]  ;;  %s2549_s7 = smov 64  }
  0x19   :  { %s2572_s1 = sld [smem:[#allocation9_spill]]  ;;  %s2548_s28 = smov 48  }
  0x1a   :  { %s2573_s29 = sld [smem:[#allocation16_spill]]  ;;  %s2578_s27 = smov 80  }
  0x1b   :  { %v155_v21 = vld [vmem:[%s2568_s0 + $0x18] sm:$0xff]  ;;  %v154_v22 = vld [vmem:[%s2568_s0 + $0x10] sm:$0xff]  ;;  %v153_v23 = vld [vmem:[%s2568_s0 + $0x8] sm:$0xff]  ;;  %s2574_s6 = sld [smem:[#allocation17_spill]] }
  0x1c   :  { %93 = vadd.xlane.f32.xlu0 %v92_v3  ;;  %v1759_v5 = vpop.eup %1758  ;;  %178 = vmatpush.msra.mxu0 %v155_v21  ;;  %v152_v24 = vld [vmem:[%s2568_s0] sm:$0xff] }
  0x1d   :  { %v96_v6 = vmul.f32 32.0, %v1759_v5  ;;  %vm100_vm1 = vweird.f32 %v1759_v5  ;;  %v1734_v39 = vld [vmem:[%s2569_s3] ss:$0 sm:$0xff] }
  0x1e   :  { %179 = vmatpush.msra.mxu0 %v154_v22  ;;  %v1735_v43 = vld [vmem:[%s2570_s8] ss:$0 sm:$0xff] }
  0x1f   :  { %v97_v7 = vsub.f32 1.0, %v96_v6  ;;  %v1736_v53 = vld [vmem:[%s2571_s9] ss:$0 sm:$0xff] }
  0x20   :  { %180 = vmatpush.msra.mxu0 %v153_v23 }
  0x21   :  { %v98_v8 = vmul.f32 %v1759_v5, %v97_v7 }
  0x22   :  { %181 = vmatpush.msra.mxu0 %v152_v24 }
  0x23   :  { %v99_v9 = vadd.f32 %v1759_v5, %v98_v8 }
  0x25   :  { %v2033_v10 = vsel %vm100_vm1, %v1759_v5, %v99_v9  ;;  %v2106_v5 = vld [vmem:[%s2572_s1 + $0x1] ss:$0 sm:$0xff] }
  0x87   :  { %v91_v11 = vpop.xlane.xlu0 %90 }
  0x88   :  { %v102_v12 = vmul.f32 %v2033_v10, %v91_v11 }
  0x8a   :  { %v104_v13 = vsub.f32 %v84_v0, %v102_v12  ;;  %v2099_v0 = vld [vmem:[%s2572_s1] ss:$0 sm:$0xff]  ;;  %s2575_s1 = sld [smem:[#allocation18_spill]] }
  0x8c   :  { %v106_v14 = vmul.f32 %v104_v13, %v104_v13 }
  0x8e   :  { %v108_v15 = vsel %vm88_vm0, %v106_v14, 0.0 }
  0x8f   :  { %109 = vadd.xlane.f32.xlu1 %v108_v15  ;;  %v94_v16 = vpop.xlane.xlu0 %93 }
  0x90   :  { %v103_v17 = vmul.f32 %v2033_v10, %v94_v16 }
  0x92   :  { %v105_v18 = vsub.f32 %v85_v1, %v103_v17 }
  0x94   :  { %v107_v19 = vmul.f32 %v105_v18, %v105_v18 }
  0x96   :  { %v111_v20 = vsel %vm88_vm0, %v107_v19, 0.0 }
  0x97   :  { %112 = vadd.xlane.f32.xlu1 %v111_v20 }
 0x102   :  { %v110_v25 = vpop.xlane.xlu1 %109 }
 0x103   :  { %v114_v26 = vmul.f32 %v110_v25, %v2033_v10 }
 0x105   :  { %v116_v27 = vadd.f32 1e-12, %v114_v26 }
 0x107   :  { %1760 = vrsqrt.f32 %v116_v27  ;;  %vm124_vm3 = vweird.f32 %v116_v27 }
 0x10a   :  { %v113_v28 = vpop.xlane.xlu1 %112 }
 0x10b   :  { %v115_v29 = vmul.f32 %v113_v28, %v2033_v10 }
 0x10d   :  { %v1761_v30 = vpop.eup %1760  ;;  %v117_v31 = vadd.f32 1e-12, %v115_v29 }
 0x10e   :  { %v119_v32 = vmul.f32 %v1761_v30, %v116_v27  ;;  %vm125_vm2 = vweird.f32 %v1761_v30 }
 0x10f   :  { %1762 = vrsqrt.f32 %v117_v31  ;;  %vm126_vm4 = vmor %vm124_vm3, %vm125_vm2  ;;  %vm134_vm5 = vweird.f32 %v117_v31 }
 0x110   :  { %v120_v33 = vmul.f32 %v1761_v30, %v119_v32 }
 0x112   :  { %v121_v34 = vmul.f32 0.5, %v120_v33 }
 0x114   :  { %v122_v35 = vsub.f32 1.5, %v121_v34 }
 0x115   :  { %v1763_v36 = vpop.eup %1762 }
 0x116   :  { %v123_v37 = vmul.f32 %v1761_v30, %v122_v35  ;;  %v129_v38 = vmul.f32 %v1763_v36, %v117_v31  ;;  %vm135_vm6 = vweird.f32 %v1763_v36 }
 0x117   :  { %vm136_vm7 = vmor %vm134_vm5, %vm135_vm6 }
 0x118   :  { %v127_v40 = vsel %vm126_vm4, %v1761_v30, %v123_v37  ;;  %v130_v41 = vmul.f32 %v1763_v36, %v129_v38 }
 0x119   :  { %v138_v42 = vmul.f32 %v127_v40, %v104_v13 }
 0x11a   :  { %v131_v44 = vmul.f32 0.5, %v130_v41 }
 0x11b   :  { %v143_v45 = vmul.f32 %v1734_v39, %v138_v42 }
 0x11c   :  { %v132_v46 = vsub.f32 1.5, %v131_v44 }
 0x11d   :  { %v2059_v47 = vadd.f32 %v1735_v43, %v143_v45 }
 0x11e   :  { %v133_v48 = vmul.f32 %v1763_v36, %v132_v46 }
 0x11f   :  { %1634 = vmatmul.msk.f32.vlgmr.msra.gmra.mxu0 %vm88_vm0, %v2059_v47 }
 0x120   :  { %v137_v49 = vsel %vm136_vm7, %v1763_v36, %v133_v48 }
 0x121   :  { %v139_v50 = vmul.f32 %v137_v49, %v105_v18 }
 0x123   :  { %v144_v51 = vmul.f32 %v1734_v39, %v139_v50 }
 0x125   :  { %v2063_v52 = vadd.f32 %v1735_v43, %v144_v51 }
 0x127   :  { %1635 = vmatmul.msk.f32.gmra.mxu0 %vm88_vm0, %v2063_v52 }
 0x19c   :  { %v183_v54 = vpop.f32.mrf.mxu0 }
 0x19d   :  { %v2070_v55 = vadd.f32 %v1736_v53, %v183_v54 }
 0x19f   :  { %361 = vrot.lane.b32.xlu0 %v2070_v55, %s2550_s30  ;;  %194 = vrot.lane.b32.xlu2 %v2070_v55, %s2554_s2 }
 0x1a0   :  { %359 = vrot.lane.b32.xlu1 %v2070_v55, %s2552_s5 }
 0x1a4   :  { %v186_v56 = vpop.f32.mrf.mxu0 }
 0x1a5   :  { %v2078_v57 = vadd.f32 %v1736_v53, %v186_v56 }
 0x1a7   :  { %222 = vrot.lane.b32.xlu2 %v2078_v57, %s2554_s2  ;;  %v1718_v35 = vpack.i.bf16 %v2078_v57, %v2070_v55 }
 0x1af   :  { %389 = vrot.lane.b32.xlu2 %v2078_v57, %s2550_s30  ;;  %s2580_s30 = smov 48  }
 0x1b7   :  { %387 = vrot.lane.b32.xlu2 %v2078_v57, %s2552_s5 }
 0x1f9   :  { %v195_v58 = vpop.permute.xlu2 %194 }
 0x1fa   :  { %1636 = vmatpush.xpose.msk.msra.mxu1 %vm196_vm8, %v195_v58 }
 0x1fd   :  { %1637 = vmatmul.msk.f32.vlgmr.msra.gmra.mxu1 %vm196_vm8, %v2070_v55 }
 0x201   :  { %v223_v59 = vpop.permute.xlu2 %222 }
 0x202   :  { %1638 = vmatpush.xpose.msk.msra.mxu2 %vm196_vm8, %v223_v59 }
 0x205   :  { %1639 = vmatmul.msk.f32.vlgmr.msra.gmra.mxu2 %vm196_vm8, %v2078_v57 }
 0x209   :  { %v390_v60 = vpop.permute.xlu2 %389 }
 0x20a   :  { %1644 = vmatpush.xpose.msk.msrb.mxu2 %vm196_vm8, %v390_v60 }
 0x211   :  { %v388_v61 = vpop.permute.xlu2 %387  ;;  %v362_v62 = vpop.permute.xlu0 %361 }
 0x212   :  { %1642 = vmatpush.xpose.msk.msrb.mxu1 %vm196_vm8, %v362_v62  ;;  %1645 = vmatmul.msk.f32.vlgmr.msrb.gmra.mxu2 %vm196_vm8, %v388_v61  ;;  %v360_v63 = vpop.permute.xlu1 %359 }
 0x215   :  { %1643 = vmatmul.msk.f32.vlgmr.msrb.gmra.mxu1 %vm196_vm8, %v360_v63 }
 0x27a   :  { %v218_v1 = vpop.f32.mrf.mxu1 }
 0x27b   :  { %v248_v2 = vmul.f32 0.25, %v218_v1 }
 0x27d   :  { %v256_v3 = vadd.f32 %v2099_v0, %v248_v2 }
 0x27f   :  { %v259_v4 = vsel %vm258_vm9, %v256_v3, -inf }
 0x280   :  { %260 = vmax.xlane.f32.xlu2 %v259_v4 }
 0x288   :  { %v245_v6 = vpop.f32.mrf.mxu2 }
 0x289   :  { %v249_v7 = vmul.f32 0.25, %v245_v6 }
 0x28b   :  { %v257_v8 = vadd.f32 %v2106_v5, %v249_v7 }
 0x28d   :  { %v262_v9 = vsel %vm258_vm9, %v257_v8, -inf }
 0x28e   :  { %263 = vmax.xlane.f32.xlu0 %v262_v9 }
 0x292   :  { %v384_v11 = vpop.f32.mrf.mxu1 }
 0x293   :  { %v415_v12 = vmul.f32 0.25, %v384_v11 }
 0x295   :  { %v412_v13 = vpop.f32.mrf.mxu2  ;;  %v417_v14 = vadd.f32 %v2099_v0, %v415_v12 }
 0x296   :  { %v416_v15 = vmul.f32 0.25, %v412_v13 }
 0x297   :  { %v419_v16 = vsel %vm258_vm9, %v417_v14, -inf }
 0x298   :  { %420 = vmax.xlane.f32.xlu1 %v419_v16  ;;  %v418_v17 = vadd.f32 %v2106_v5, %v416_v15 }
 0x29a   :  { %v422_v18 = vsel %vm258_vm9, %v418_v17, -inf }
 0x29b   :  { %423 = vmax.xlane.f32.xlu2 %v422_v18 }
 0x2f3   :  { %v261_v19 = vpop.xlane.xlu2 %260 }
 0x2f4   :  { %v265_v20 = vsub.f32 %v256_v3, %v261_v19 }
 0x2f6   :  { %v267_v21 = vmul.f32 1.442695, %v265_v20 }
 0x2f8   :  { %1764 = vpow2.f32 %v267_v21 }
 0x2fe   :  { %v1765_v22 = vpop.eup %1764 }
 0x2ff   :  { %v271_v23 = vsel %vm258_vm9, %v1765_v22, 0.0 }
 0x300   :  { %272 = vadd.xlane.f32.xlu0 %v271_v23 }
 0x301   :  { %v264_v24 = vpop.xlane.xlu0 %263 }
 0x302   :  { %v266_v25 = vsub.f32 %v257_v8, %v264_v24 }
 0x304   :  { %v269_v26 = vmul.f32 1.442695, %v266_v25 }
 0x306   :  { %1766 = vpow2.f32 %v269_v26 }
 0x30b   :  { %v421_v27 = vpop.xlane.xlu1 %420 }
 0x30c   :  { %v2115_v28 = vpop.eup %1766  ;;  %v425_v29 = vsub.f32 %v417_v14, %v421_v27  ;;  %v190_v14 = vld [vmem:[%s2573_s29 + $0x8] sm:$0xff] }
 0x30d   :  { %v274_v30 = vsel %vm258_vm9, %v2115_v28, 0.0 }
 0x30e   :  { %v427_v31 = vmul.f32 1.442695, %v425_v29  ;;  %v424_v32 = vpop.xlane.xlu2 %423  ;;  %275 = vadd.xlane.f32.xlu2 %v274_v30 }
 0x30f   :  { %v426_v33 = vsub.f32 %v418_v17, %v424_v32 }
 0x310   :  { %1768 = vpow2.f32 %v427_v31 }
 0x311   :  { %v429_v34 = vmul.f32 1.442695, %v426_v33 }
 0x313   :  { %1770 = vpow2.f32 %v429_v34 }
 0x314   :  { %1719 = vrot.lane.b32.xlu0 %v1718_v35, %s2549_s7  ;;  %v189_v35 = vld [vmem:[%s2573_s29] sm:$0xff]  ;;  %s2576_s7 = smov 96  }
 0x316   :  { %v2122_v36 = vpop.eup %1768 }
 0x317   :  { %v431_v37 = vsel %vm258_vm9, %v2122_v36, 0.0 }
 0x318   :  { %432 = vadd.xlane.f32.xlu1 %v431_v37  ;;  %v192_v37 = vld [vmem:[%s2573_s29 + $0x18] sm:$0xff] }
 0x319   :  { %v2126_v38 = vpop.eup %1770  ;;  %539 = vmatpush.msra.mxu2 %v192_v37  ;;  %v703_v37 = vld [vmem:[%s2528_s14 + $0x38] sm:$0xff] }
 0x31a   :  { %v434_v39 = vsel %vm258_vm9, %v2126_v38, 0.0 }
 0x31b   :  { %435 = vadd.xlane.f32.xlu2 %v434_v39 }
 0x331   :  { %467 = vrot.lane.b32.xlu1 %v2070_v55, %s2548_s28 }
 0x333   :  { %493 = vrot.lane.b32.xlu2 %v2078_v57, %s2548_s28  ;;  %s2577_s28 = smov 112  }
 0x373   :  { %v273_v40 = vpop.xlane.xlu0 %272 }
 0x374   :  { %1772 = vrcp.f32 %v273_v40  ;;  %v288_v45 = vand.u32 2147483648, %v273_v40  ;;  %v286_v46 = vand.u32 2147483647, %v273_v40  ;;  %vm282_vm11 = vweird.f32 %v273_v40 }
 0x376   :  { %v289_v50 = vor.u32 1.1754944e-38, %v288_v45  ;;  %vm287_vm13 = vcmp.eq.f32.partialorder %v286_v46, 8.507059e+37 }
 0x37a   :  { %v1773_v41 = vpop.eup %1772 }
 0x37b   :  { %v278_v42 = vmul.f32 %v1773_v41, %v273_v40  ;;  %vm283_vm10 = vweird.f32 %v1773_v41 }
 0x37c   :  { %vm284_vm12 = vmor %vm282_vm11, %vm283_vm10 }
 0x37d   :  { %v279_v43 = vsub.f32 1.0, %v278_v42  ;;  %v1739_v42 = vld [vmem:[%s2574_s6] ss:$0 sm:$0xff] }
 0x37f   :  { %v280_v44 = vmul.f32 %v1773_v41, %v279_v43 }
 0x381   :  { %v276_v48 = vpop.xlane.xlu2 %275  ;;  %v281_v49 = vadd.f32 %v1773_v41, %v280_v44 }
 0x382   :  { %1774 = vrcp.f32 %v276_v48  ;;  %v303_v62 = vand.u32 2147483648, %v276_v48  ;;  %v301_v1 = vand.u32 2147483647, %v276_v48  ;;  %vm297_vm15 = vweird.f32 %v276_v48 }
 0x383   :  { %v285_v51 = vsel %vm284_vm12, %v1773_v41, %v281_v49 }
 0x384   :  { %v290_v53 = vsel %vm287_vm13, %v289_v50, %v285_v51  ;;  %v304_v4 = vor.u32 1.1754944e-38, %v303_v62  ;;  %vm302_vm2 = vcmp.eq.f32.partialorder %v301_v1, 8.507059e+37 }
 0x385   :  { %v291_v58 = vmul.f32 %v1765_v22, %v290_v53 }
 0x386   :  { %v1720_v54 = vpop.permute.xlu0 %1719 }
 0x387   :  { %v1721_v55 = vunpack.i.l.bf16 %v1720_v54  ;;  %v1722_v56 = vunpack.i.h.bf16 %v1720_v54 }
 0x388   :  { %v1775_v57 = vpop.eup %1774 }
 0x389   :  { %v293_v59 = vmul.f32 %v1775_v57, %v276_v48  ;;  %328 = vmatpush.msra.mxu3 %v1721_v55  ;;  %vm298_vm14 = vweird.f32 %v1775_v57 }
 0x38a   :  { %1640 = vmatmul.msk.f32.vlgmr.msra.gmra.mxu3 %vm258_vm9, %v291_v58  ;;  %vm299_vm1 = vmor %vm297_vm15, %vm298_vm14 }
 0x38b   :  { %v294_v60 = vsub.f32 1.0, %v293_v59  ;;  %354 = vmatpush.msrb.mxu3 %v1722_v56  ;;  %v433_v61 = vpop.xlane.xlu1 %432 }
 0x38c   :  { %1776 = vrcp.f32 %v433_v61  ;;  %v448_v21 = vand.u32 2147483648, %v433_v61  ;;  %vm442_vm5 = vweird.f32 %v433_v61  ;;  %v446_v24 = vand.u32 2147483647, %v433_v61 }
 0x38d   :  { %v295_v63 = vmul.f32 %v1775_v57, %v294_v60 }
 0x38e   :  { %v436_v2 = vpop.xlane.xlu2 %435  ;;  %vm447_vm12 = vcmp.eq.f32.partialorder %v446_v24, 8.507059e+37 }
 0x38f   :  { %v296_v3 = vadd.f32 %v1775_v57, %v295_v63  ;;  %1778 = vrcp.f32 %v436_v2  ;;  %v463_v20 = vand.u32 2147483648, %v436_v2  ;;  %v461_v23 = vand.u32 2147483647, %v436_v2 }
 0x390   :  { %vm457_vm7 = vweird.f32 %v436_v2 }
 0x391   :  { %v300_v6 = vsel %vm299_vm1, %v1775_v57, %v296_v3  ;;  %v464_v27 = vor.u32 1.1754944e-38, %v463_v20  ;;  %vm462_vm11 = vcmp.eq.f32.partialorder %v461_v23, 8.507059e+37  ;;  %v643_v3 = vld [vmem:[%s2526_s12 + $0x10] sm:$0xff] }
 0x392   :  { %v1777_v7 = vpop.eup %1776  ;;  %v305_v8 = vsel %vm302_vm2, %v304_v4, %v300_v6  ;;  %v642_v4 = vld [vmem:[%s2526_s12 + $0x8] sm:$0xff]  ;;  %v641_v6 = vld [vmem:[%s2526_s12] sm:$0xff] }
 0x393   :  { %v438_v9 = vmul.f32 %v1777_v7, %v433_v61  ;;  %v306_v11 = vmul.f32 %v2115_v28, %v305_v8  ;;  %vm443_vm3 = vweird.f32 %v1777_v7  ;;  %v449_v28 = vor.u32 1.1754944e-38, %v448_v21 }
 0x394   :  { %vm444_vm6 = vmor %vm442_vm5, %vm443_vm3 }
 0x395   :  { %v1779_v12 = vpop.eup %1778  ;;  %v439_v13 = vsub.f32 1.0, %v438_v9  ;;  %1641 = vmatmul.msk.f32.vlgmr.msrb.gmra.mxu3 %vm258_vm9, %v306_v11 }
 0x396   :  { %v453_v15 = vmul.f32 %v1779_v12, %v436_v2  ;;  %v494_v16 = vpop.permute.xlu2 %493  ;;  %vm458_vm4 = vweird.f32 %v1779_v12 }
 0x397   :  { %v440_v17 = vmul.f32 %v1777_v7, %v439_v13  ;;  %514 = vmatpush.msra.mxu1 %v494_v16  ;;  %vm459_vm10 = vmor %vm457_vm7, %vm458_vm4  ;;  %vm708_vm4 = vcmask 523264  }
 0x398   :  { %v454_v18 = vsub.f32 1.0, %v453_v15 }
 0x399   :  { %568 = vmatpush.msrb.mxu1 %v190_v14  ;;  %v441_v19 = vadd.f32 %v1777_v7, %v440_v17 }
 0x39a   :  { %v455_v22 = vmul.f32 %v1779_v12, %v454_v18 }
 0x39b   :  { %v445_v26 = vsel %vm444_vm6, %v1777_v7, %v441_v19  ;;  %569 = vmatpush.msrb.mxu1 %v189_v35 }
 0x39c   :  { %v456_v25 = vadd.f32 %v1779_v12, %v455_v22  ;;  %v450_v31 = vsel %vm447_vm12, %v449_v28, %v445_v26  ;;  %v1740_v22 = vld [vmem:[%s2575_s1] ss:$0 sm:$0xff] }
 0x39d   :  { %v451_v34 = vmul.f32 %v2122_v36, %v450_v31  ;;  %v1741_v26 = vld [vmem:[%s2525_s11] ss:$0 sm:$0xff] }
 0x39e   :  { %v460_v29 = vsel %vm459_vm10, %v1779_v12, %v456_v25 }
 0x39f   :  { %v465_v30 = vsel %vm462_vm11, %v464_v27, %v460_v29 }
 0x3a0   :  { %v466_v32 = vmul.f32 %v2126_v38, %v465_v30  ;;  %v191_v38 = vld [vmem:[%s2573_s29 + $0x10] sm:$0xff] }
 0x3a1   :  { %540 = vmatpush.msra.mxu2 %v191_v38  ;;  %v702_v38 = vld [vmem:[%s2528_s14 + $0x30] sm:$0xff] }
 0x3a2   :  { %1647 = vmatmul.msk.f32.vlgmr.msra.gmra.mxu1 %vm258_vm9, %v466_v32 }
 0x3a3   :  { %v468_v33 = vpop.permute.xlu1 %467  ;;  %723 = vmatpush.msra.mxu1 %v703_v37 }
 0x3a4   :  { %488 = vmatpush.msra.mxu3 %v468_v33 }
 0x3a5   :  { %1646 = vmatmul.msk.f32.vlgmr.msra.gmra.mxu3 %vm258_vm9, %v451_v34  ;;  %724 = vmatpush.msra.mxu1 %v702_v38 }
 0x40d   :  { %v330_v39 = vpop.f32.mrf.mxu3 }
 0x40e   :  { %1650 = vmatmul.msk.f32.vlgmr.msrb.gmra.mxu1 %vm196_vm8, %v330_v39  ;;  %v701_v39 = vld [vmem:[%s2528_s14 + $0x28] sm:$0xff] }
 0x40f   :  { %725 = vmatpush.msra.mxu1 %v701_v39 }
 0x418   :  { %v356_v36 = vpop.f32.mrf.mxu3 }
 0x419   :  { %1651 = vmatmul.msk.f32.gmra.mxu1 %vm196_vm8, %v356_v36  ;;  %v700_v36 = vld [vmem:[%s2528_s14 + $0x20] sm:$0xff] }
 0x41a   :  { %726 = vmatpush.msra.mxu1 %v700_v36 }
 0x41f   :  { %v516_v41 = vpop.f32.mrf.mxu1 }
 0x428   :  { %v490_v40 = vpop.f32.mrf.mxu3 }
 0x429   :  { %1648 = vmatmul.msk.f32.vlgmr.msra.gmra.mxu2 %vm196_vm8, %v490_v40  ;;  %v699_v40 = vld [vmem:[%s2528_s14 + $0x18] sm:$0xff] }
 0x42a   :  { %727 = vmatpush.msra.mxu1 %v699_v40 }
 0x431   :  { %1649 = vmatmul.msk.f32.gmra.mxu2 %vm196_vm8, %v516_v41  ;;  %v698_v41 = vld [vmem:[%s2528_s14 + $0x10] sm:$0xff] }
 0x432   :  { %728 = vmatpush.msra.mxu1 %v698_v41 }
 0x48b   :  { %v571_v43 = vpop.f32.mrf.mxu1 }
 0x496   :  { %v574_v50 = vpop.f32.mrf.mxu1 }
 0x4ac   :  { %v542_v44 = vpop.f32.mrf.mxu2 }
 0x4ad   :  { %v572_v45 = vadd.f32 %v571_v43, %v542_v44  ;;  %v696_v43 = vld [vmem:[%s2528_s14] sm:$0xff] }
 0x4ae   :  { %v1742_v44 = vld [vmem:[%s2527_s13] ss:$0 sm:$0xff] }
 0x4af   :  { %v581_v46 = vadd.f32 %v1739_v42, %v572_v45 }
 0x4b1   :  { %v583_v48 = vadd.f32 %v581_v46, %v2059_v47 }
 0x4b3   :  { %v587_v49 = vsel %vm88_vm0, %v583_v48, 0.0 }
 0x4b4   :  { %588 = vadd.xlane.f32.xlu0 %v587_v49  ;;  %v545_v51 = vpop.f32.mrf.mxu2 }
 0x4b5   :  { %v575_v53 = vadd.f32 %v574_v50, %v545_v51 }
 0x4b7   :  { %v582_v54 = vadd.f32 %v1739_v42, %v575_v53  ;;  %v697_v42 = vld [vmem:[%s2528_s14 + $0x8] sm:$0xff] }
 0x4b8   :  { %729 = vmatpush.msra.mxu1 %v697_v42 }
 0x4b9   :  { %v584_v55 = vadd.f32 %v582_v54, %v2063_v52  ;;  %v644_v52 = vld [vmem:[%s2526_s12 + $0x18] sm:$0xff] }
 0x4ba   :  { %667 = vmatpush.msrb.mxu3 %v644_v52  ;;  %730 = vmatpush.msra.mxu1 %v696_v43  ;;  %v1744_v43 = vld [vmem:[%s2530_s16] ss:$0 sm:$0xff] }
 0x4bb   :  { %v590_v56 = vsel %vm88_vm0, %v584_v55, 0.0 }
 0x4bc   :  { %591 = vadd.xlane.f32.xlu1 %v590_v56  ;;  %668 = vmatpush.msrb.mxu3 %v643_v3 }
 0x4be   :  { %669 = vmatpush.msrb.mxu3 %v642_v4  ;;  %v1743_v4 = vld [vmem:[%s2529_s15] ss:$0 sm:$0xff] }
 0x4c0   :  { %670 = vmatpush.msrb.mxu3 %v641_v6 }
 0x527   :  { %v589_v57 = vpop.xlane.xlu0 %588 }
 0x528   :  { %v593_v58 = vmul.f32 %v589_v57, %v2033_v10 }
 0x52a   :  { %v595_v59 = vsub.f32 %v583_v48, %v593_v58 }
 0x52c   :  { %v597_v60 = vmul.f32 %v595_v59, %v595_v59 }
 0x52e   :  { %v599_v61 = vsel %vm88_vm0, %v597_v60, 0.0 }
 0x52f   :  { %600 = vadd.xlane.f32.xlu2 %v599_v61  ;;  %v592_v47 = vpop.xlane.xlu1 %591 }
 0x530   :  { %v594_v62 = vmul.f32 %v592_v47, %v2033_v10 }
 0x532   :  { %v596_v63 = vsub.f32 %v584_v55, %v594_v62 }
 0x534   :  { %v598_v1 = vmul.f32 %v596_v63, %v596_v63 }
 0x536   :  { %v602_v2 = vsel %vm88_vm0, %v598_v1, 0.0 }
 0x537   :  { %603 = vadd.xlane.f32.xlu0 %v602_v2 }
 0x5a2   :  { %v601_v7 = vpop.xlane.xlu2 %600 }
 0x5a3   :  { %v605_v8 = vmul.f32 %v601_v7, %v2033_v10 }
 0x5a5   :  { %v607_v9 = vadd.f32 1e-12, %v605_v8 }
 0x5a7   :  { %1780 = vrsqrt.f32 %v607_v9  ;;  %vm615_vm14 = vweird.f32 %v607_v9 }
 0x5aa   :  { %v604_v11 = vpop.xlane.xlu0 %603 }
 0x5ab   :  { %v606_v12 = vmul.f32 %v604_v11, %v2033_v10 }
 0x5ad   :  { %v1781_v13 = vpop.eup %1780  ;;  %v608_v14 = vadd.f32 1e-12, %v606_v12 }
 0x5ae   :  { %v610_v15 = vmul.f32 %v1781_v13, %v607_v9  ;;  %vm616_vm13 = vweird.f32 %v1781_v13 }
 0x5af   :  { %1782 = vrsqrt.f32 %v608_v14  ;;  %vm617_vm15 = vmor %vm615_vm14, %vm616_vm13  ;;  %vm625_vm2 = vweird.f32 %v608_v14 }
 0x5b0   :  { %v611_v16 = vmul.f32 %v1781_v13, %v610_v15 }
 0x5b2   :  { %v612_v17 = vmul.f32 0.5, %v611_v16 }
 0x5b4   :  { %v613_v18 = vsub.f32 1.5, %v612_v17 }
 0x5b5   :  { %v1783_v19 = vpop.eup %1782 }
 0x5b6   :  { %v614_v20 = vmul.f32 %v1781_v13, %v613_v18  ;;  %v620_v21 = vmul.f32 %v1783_v19, %v608_v14  ;;  %vm626_vm1 = vweird.f32 %v1783_v19 }
 0x5b7   :  { %vm627_vm3 = vmor %vm625_vm2, %vm626_vm1 }
 0x5b8   :  { %v618_v23 = vsel %vm617_vm15, %v1781_v13, %v614_v20  ;;  %v621_v24 = vmul.f32 %v1783_v19, %v620_v21 }
 0x5b9   :  { %v629_v25 = vmul.f32 %v618_v23, %v595_v59 }
 0x5ba   :  { %v622_v27 = vmul.f32 0.5, %v621_v24 }
 0x5bb   :  { %v634_v28 = vmul.f32 %v1740_v22, %v629_v25  ;;  %v1659_v25 = vld [vmem:[%s2568_s0 + $0x38] sm:$0xff] }
 0x5bc   :  { %v623_v29 = vsub.f32 1.5, %v622_v27  ;;  %824 = vmatpush.msrb.mxu2 %v1659_v25  ;;  %v1657_v27 = vld [vmem:[%s2568_s0 + $0x28] sm:$0xff] }
 0x5bd   :  { %v639_v30 = vadd.f32 %v1741_v26, %v634_v28  ;;  %v1656_v28 = vld [vmem:[%s2568_s0 + $0x20] sm:$0xff] }
 0x5be   :  { %v624_v31 = vmul.f32 %v1783_v19, %v623_v29 }
 0x5bf   :  { %1652 = vmatmul.msk.f32.vlgmr.msrb.gmra.mxu3 %vm88_vm0, %v639_v30 }
 0x5c0   :  { %v628_v32 = vsel %vm627_vm3, %v1783_v19, %v624_v31 }
 0x5c1   :  { %v630_v33 = vmul.f32 %v628_v32, %v596_v63 }
 0x5c3   :  { %v635_v34 = vmul.f32 %v1740_v22, %v630_v33 }
 0x5c5   :  { %v640_v35 = vadd.f32 %v1741_v26, %v635_v34  ;;  %v1658_v26 = vld [vmem:[%s2568_s0 + $0x30] sm:$0xff] }
 0x5c6   :  { %825 = vmatpush.msrb.mxu2 %v1658_v26 }
 0x5c7   :  { %1653 = vmatmul.msk.f32.gmra.mxu3 %vm88_vm0, %v640_v35 }
 0x5c8   :  { %826 = vmatpush.msrb.mxu2 %v1657_v27 }
 0x5ca   :  { %827 = vmatpush.msrb.mxu2 %v1656_v28 }
 0x642   :  { %v672_v45 = vpop.f32.mrf.mxu3 }
 0x643   :  { %v673_v46 = vadd.f32 %v1742_v44, %v672_v45 }
 0x645   :  { %v678_v48 = vmul.f32 %v673_v46, %v673_v46 }
 0x647   :  { %v680_v49 = vmul.f32 %v678_v48, %v673_v46  ;;  %v1745_v48 = vld [vmem:[%s2531_s17] ss:$0 sm:$0xff] }
 0x649   :  { %v682_v50 = vmul.f32 0.044715, %v680_v49 }
 0x64a   :  { %v675_v51 = vpop.f32.mrf.mxu3 }
 0x64b   :  { %v684_v53 = vadd.f32 %v682_v50, %v673_v46  ;;  %v676_v54 = vadd.f32 %v1742_v44, %v675_v51 }
 0x64d   :  { %v686_v55 = vmul.f32 0.7978846, %v684_v53  ;;  %v679_v56 = vmul.f32 %v676_v54, %v676_v54 }
 0x64f   :  { %1784 = vtanh.f32 %v686_v55  ;;  %v681_v57 = vmul.f32 %v679_v56, %v676_v54 }
 0x651   :  { %v683_v58 = vmul.f32 0.044715, %v681_v57 }
 0x653   :  { %v685_v59 = vadd.f32 %v683_v58, %v676_v54 }
 0x655   :  { %v1785_v60 = vpop.eup %1784  ;;  %v687_v61 = vmul.f32 0.7978846, %v685_v59  ;;  %v1746_v59 = vld [vmem:[%s2571_s9 + $0x1] ss:$0 sm:$0xff]  ;;  %s2579_s9 = smov 64  }
 0x656   :  { %v690_v47 = vadd.f32 1.0, %v1785_v60 }
 0x657   :  { %1786 = vtanh.f32 %v687_v61 }
 0x658   :  { %v692_v62 = vmul.f32 0.5, %v690_v47 }
 0x65a   :  { %v694_v63 = vmul.f32 %v692_v62, %v673_v46 }
 0x65c   :  { %1654 = vmatmul.msk.f32.vlgmr.msra.gmra.mxu1 %vm708_vm4, %v694_v63 }
 0x65d   :  { %v1787_v1 = vpop.eup %1786 }
 0x65e   :  { %v691_v2 = vadd.f32 1.0, %v1787_v1 }
 0x660   :  { %v693_v52 = vmul.f32 0.5, %v691_v2 }
 0x662   :  { %v695_v3 = vmul.f32 %v693_v52, %v676_v54 }
 0x664   :  { %1655 = vmatmul.msk.f32.gmra.mxu1 %vm708_vm4, %v695_v3 }
 0x6d9   :  { %v732_v6 = vpop.f32.mrf.mxu1 }
 0x6da   :  { %v733_v7 = vadd.f32 %v1743_v4, %v732_v6 }
 0x6dc   :  { %v738_v8 = vadd.f32 %v733_v7, %v639_v30 }
 0x6de   :  { %v742_v9 = vsel %vm88_vm0, %v738_v8, 0.0 }
 0x6df   :  { %743 = vadd.xlane.f32.xlu0 %v742_v9 }
 0x6e1   :  { %v735_v11 = vpop.f32.mrf.mxu1 }
 0x6e2   :  { %v736_v12 = vadd.f32 %v1743_v4, %v735_v11 }
 0x6e4   :  { %v739_v13 = vadd.f32 %v736_v12, %v640_v35 }
 0x6e6   :  { %v745_v14 = vsel %vm88_vm0, %v739_v13, 0.0 }
 0x6e7   :  { %746 = vadd.xlane.f32.xlu1 %v745_v14 }
 0x752   :  { %v744_v15 = vpop.xlane.xlu0 %743 }
 0x753   :  { %v748_v16 = vmul.f32 %v744_v15, %v2033_v10 }
 0x755   :  { %v750_v17 = vsub.f32 %v738_v8, %v748_v16 }
 0x757   :  { %v752_v18 = vmul.f32 %v750_v17, %v750_v17 }
 0x759   :  { %v754_v19 = vsel %vm88_vm0, %v752_v18, 0.0 }
 0x75a   :  { %v747_v20 = vpop.xlane.xlu1 %746  ;;  %755 = vadd.xlane.f32.xlu2 %v754_v19 }
 0x75b   :  { %v749_v21 = vmul.f32 %v747_v20, %v2033_v10 }
 0x75d   :  { %v751_v22 = vsub.f32 %v739_v13, %v749_v21 }
 0x75f   :  { %v753_v23 = vmul.f32 %v751_v22, %v751_v22 }
 0x761   :  { %v757_v24 = vsel %vm88_vm0, %v753_v23, 0.0 }
 0x762   :  { %758 = vadd.xlane.f32.xlu0 %v757_v24 }
 0x7cd   :  { %v756_v29 = vpop.xlane.xlu2 %755 }
 0x7ce   :  { %v760_v30 = vmul.f32 %v756_v29, %v2033_v10 }
 0x7d0   :  { %v762_v31 = vadd.f32 1e-12, %v760_v30 }
 0x7d2   :  { %1788 = vrsqrt.f32 %v762_v31  ;;  %vm770_vm6 = vweird.f32 %v762_v31 }
 0x7d5   :  { %v759_v32 = vpop.xlane.xlu0 %758 }
 0x7d6   :  { %v761_v33 = vmul.f32 %v759_v32, %v2033_v10 }
 0x7d8   :  { %v1789_v34 = vpop.eup %1788  ;;  %v763_v35 = vadd.f32 1e-12, %v761_v33 }
 0x7d9   :  { %v765_v37 = vmul.f32 %v1789_v34, %v762_v31  ;;  %vm771_vm5 = vweird.f32 %v1789_v34 }
 0x7da   :  { %1790 = vrsqrt.f32 %v763_v35  ;;  %vm772_vm7 = vmor %vm770_vm6, %vm771_vm5  ;;  %vm780_vm11 = vweird.f32 %v763_v35 }
 0x7db   :  { %v766_v38 = vmul.f32 %v1789_v34, %v765_v37 }
 0x7dd   :  { %v767_v39 = vmul.f32 0.5, %v766_v38 }
 0x7df   :  { %v768_v36 = vsub.f32 1.5, %v767_v39 }
 0x7e0   :  { %v1791_v40 = vpop.eup %1790 }
 0x7e1   :  { %v769_v41 = vmul.f32 %v1789_v34, %v768_v36  ;;  %v775_v42 = vmul.f32 %v1791_v40, %v763_v35  ;;  %vm781_vm10 = vweird.f32 %v1791_v40 }
 0x7e2   :  { %vm782_vm12 = vmor %vm780_vm11, %vm781_vm10 }
 0x7e3   :  { %v773_v44 = vsel %vm772_vm7, %v1789_v34, %v769_v41  ;;  %v776_v45 = vmul.f32 %v1791_v40, %v775_v42 }
 0x7e4   :  { %v784_v46 = vmul.f32 %v773_v44, %v750_v17 }
 0x7e5   :  { %v777_v49 = vmul.f32 0.5, %v776_v45 }
 0x7e6   :  { %v789_v50 = vmul.f32 %v1744_v43, %v784_v46 }
 0x7e7   :  { %v778_v51 = vsub.f32 1.5, %v777_v49 }
 0x7e8   :  { %v2248_v53 = vadd.f32 %v1745_v48, %v789_v50 }
 0x7e9   :  { %v779_v54 = vmul.f32 %v1791_v40, %v778_v51 }
 0x7ea   :  { %1661 = vmatmul.msk.f32.vlgmr.msrb.gmra.mxu2 %vm88_vm0, %v2248_v53 }
 0x7eb   :  { %v783_v55 = vsel %vm782_vm12, %v1791_v40, %v779_v54 }
 0x7ec   :  { %v785_v56 = vmul.f32 %v783_v55, %v751_v22 }
 0x7ee   :  { %v790_v57 = vmul.f32 %v1744_v43, %v785_v56 }
 0x7f0   :  { %v2252_v58 = vadd.f32 %v1745_v48, %v790_v57  ;;  %v1664_v48 = vld [vmem:[%s2573_s29 + $0x28] sm:$0xff] }
 0x7f2   :  { %1662 = vmatmul.msk.f32.gmra.mxu2 %vm88_vm0, %v2252_v58 }
 0x86d   :  { %v829_v60 = vpop.f32.mrf.mxu2 }
 0x86e   :  { %v2259_v61 = vadd.f32 %v1746_v59, %v829_v60 }
 0x870   :  { %841 = vrot.lane.b32.xlu2 %v2259_v61, %s2576_s7 }
 0x875   :  { %v832_v47 = vpop.f32.mrf.mxu2 }
 0x876   :  { %v2263_v62 = vadd.f32 %v1746_v59, %v832_v47 }
 0x878   :  { %998 = vrot.lane.b32.xlu2 %v2259_v61, %s2577_s28  ;;  %1028 = vrot.lane.b32.xlu0 %v2263_v62, %s2578_s27  ;;  %v1723_v41 = vpack.i.bf16 %v2263_v62, %v2259_v61 }
 0x879   :  { %868 = vrot.lane.b32.xlu1 %v2263_v62, %s2576_s7 }
 0x880   :  { %1000 = vrot.lane.b32.xlu0 %v2259_v61, %s2578_s27 }
 0x881   :  { %1026 = vrot.lane.b32.xlu1 %v2263_v62, %s2577_s28 }
 0x8ca   :  { %v842_v63 = vpop.permute.xlu2 %841 }
 0x8cb   :  { %1667 = vmatpush.xpose.msk.msrb.mxu0 %vm196_vm8, %v842_v63 }
 0x8ce   :  { %1668 = vmatmul.msk.f32.vlgmr.msrb.gmra.mxu0 %vm196_vm8, %v2259_v61 }
 0x8d2   :  { %v999_v4 = vpop.permute.xlu2 %998 }
 0x8ea   :  { %v1029_v1 = vpop.permute.xlu0 %1028 }
 0x8eb   :  { %v869_v2 = vpop.permute.xlu1 %868  ;;  %1675 = vmatpush.xpose.msk.msra.mxu2 %vm196_vm8, %v1029_v1 }
 0x8ec   :  { %1669 = vmatpush.xpose.msk.msra.mxu3 %vm196_vm8, %v869_v2 }
 0x8ef   :  { %1670 = vmatmul.msk.f32.vlgmr.msra.gmra.mxu3 %vm196_vm8, %v2263_v62  ;;  %1207 = vmatpush.msrb.mxu2 %v1664_v48 }
 0x8f2   :  { %v1001_v52 = vpop.permute.xlu0 %1000 }
 0x8f3   :  { %v1027_v3 = vpop.permute.xlu1 %1026  ;;  %1673 = vmatpush.xpose.msk.msrb.mxu1 %vm196_vm8, %v1001_v52 }
 0x8f4   :  { %1676 = vmatmul.msk.f32.vlgmr.msra.gmra.mxu2 %vm196_vm8, %v1027_v3 }
 0x8f6   :  { %1674 = vmatmul.msk.f32.vlgmr.msrb.gmra.mxu1 %vm196_vm8, %v999_v4 }
 0x94b   :  { %v864_v6 = vpop.f32.mrf.mxu0 }
 0x94c   :  { %v894_v7 = vmul.f32 0.25, %v864_v6 }
 0x94e   :  { %v896_v8 = vadd.f32 %v2099_v0, %v894_v7 }
 0x950   :  { %v898_v9 = vsel %vm258_vm9, %v896_v8, -inf }
 0x951   :  { %899 = vmax.xlane.f32.xlu1 %v898_v9 }
 0x972   :  { %v891_v11 = vpop.f32.mrf.mxu3 }
 0x973   :  { %v895_v12 = vmul.f32 0.25, %v891_v11  ;;  %v1023_v13 = vpop.f32.mrf.mxu1 }
 0x974   :  { %v1054_v14 = vmul.f32 0.25, %v1023_v13 }
 0x975   :  { %v897_v15 = vadd.f32 %v2106_v5, %v895_v12 }
 0x976   :  { %v1056_v16 = vadd.f32 %v2099_v0, %v1054_v14 }
 0x977   :  { %v1051_v17 = vpop.f32.mrf.mxu2  ;;  %v901_v18 = vsel %vm258_vm9, %v897_v15, -inf }
 0x978   :  { %v1055_v19 = vmul.f32 0.25, %v1051_v17  ;;  %902 = vmax.xlane.f32.xlu0 %v901_v18  ;;  %v1058_v20 = vsel %vm258_vm9, %v1056_v16, -inf }
 0x979   :  { %1059 = vmax.xlane.f32.xlu2 %v1058_v20 }
 0x97a   :  { %v1057_v21 = vadd.f32 %v2106_v5, %v1055_v19 }
 0x97c   :  { %v1061_v22 = vsel %vm258_vm9, %v1057_v21, -inf }
 0x97d   :  { %1062 = vmax.xlane.f32.xlu1 %v1061_v22 }
 0x9c4   :  { %v900_v23 = vpop.xlane.xlu1 %899 }
 0x9c5   :  { %v904_v24 = vsub.f32 %v896_v8, %v900_v23 }
 0x9c7   :  { %v906_v25 = vmul.f32 1.442695, %v904_v24 }
 0x9c9   :  { %1792 = vpow2.f32 %v906_v25 }
 0x9cf   :  { %v1793_v26 = vpop.eup %1792 }
 0x9d0   :  { %v910_v0 = vsel %vm258_vm9, %v1793_v26, 0.0 }
 0x9d1   :  { %911 = vadd.xlane.f32.xlu0 %v910_v0 }
 0x9eb   :  { %v903_v27 = vpop.xlane.xlu0 %902 }
 0x9ec   :  { %v905_v28 = vsub.f32 %v897_v15, %v903_v27  ;;  %v1060_v29 = vpop.xlane.xlu2 %1059 }
 0x9ed   :  { %v1064_v30 = vsub.f32 %v1056_v16, %v1060_v29 }
 0x9ee   :  { %v908_v31 = vmul.f32 1.442695, %v905_v28 }
 0x9ef   :  { %v1066_v32 = vmul.f32 1.442695, %v1064_v30 }
 0x9f0   :  { %1794 = vpow2.f32 %v908_v31  ;;  %v1063_v33 = vpop.xlane.xlu1 %1062 }
 0x9f1   :  { %1796 = vpow2.f32 %v1066_v32  ;;  %v1065_v5 = vsub.f32 %v1057_v21, %v1063_v33 }
 0x9f3   :  { %v1068_v34 = vmul.f32 1.442695, %v1065_v5 }
 0x9f5   :  { %1798 = vpow2.f32 %v1068_v34 }
 0x9f6   :  { %v2294_v35 = vpop.eup %1794 }
 0x9f7   :  { %v2296_v37 = vpop.eup %1796  ;;  %v913_v38 = vsel %vm258_vm9, %v2294_v35, 0.0 }
 0x9f8   :  { %914 = vadd.xlane.f32.xlu2 %v913_v38  ;;  %v1070_v39 = vsel %vm258_vm9, %v2296_v37, 0.0  ;;  %v1663_v38 = vld [vmem:[%s2573_s29 + $0x20] sm:$0xff] }
 0x9f9   :  { %1071 = vadd.xlane.f32.xlu1 %v1070_v39  ;;  %1208 = vmatpush.msrb.mxu2 %v1663_v38  ;;  %v1666_v39 = vld [vmem:[%s2573_s29 + $0x38] sm:$0xff]  ;;  %v1699_v38 = vld [vmem:[%s2528_s14 + $0x70] sm:$0xff] }
 0x9fa   :  { %1178 = vmatpush.msra.mxu1 %v1666_v39  ;;  %v1698_v39 = vld [vmem:[%s2528_s14 + $0x68] sm:$0xff] }
 0x9fb   :  { %v2302_v36 = vpop.eup %1798 }
 0x9fc   :  { %v1073_v40 = vsel %vm258_vm9, %v2302_v36, 0.0 }
 0x9fd   :  { %1074 = vadd.xlane.f32.xlu0 %v1073_v40 }
 0xa10   :  { %1724 = vrot.lane.b32.xlu2 %v1723_v41, %s2579_s9 }
 0xa12   :  { %1729 = vrot.lane.b32.xlu1 %v1723_v41, %s2580_s30 }
 0xa44   :  { %v912_v42 = vpop.xlane.xlu0 %911 }
 0xa45   :  { %1800 = vrcp.f32 %v912_v42  ;;  %v927_v51 = vand.u32 2147483648, %v912_v42  ;;  %vm921_vm14 = vweird.f32 %v912_v42  ;;  %v925_v55 = vand.u32 2147483647, %v912_v42 }
 0xa47   :  { %v928_v57 = vor.u32 1.1754944e-38, %v927_v51  ;;  %vm926_vm1 = vcmp.eq.f32.partialorder %v925_v55, 8.507059e+37 }
 0xa4b   :  { %v1801_v43 = vpop.eup %1800 }
 0xa4c   :  { %v917_v44 = vmul.f32 %v1801_v43, %v912_v42  ;;  %vm922_vm13 = vweird.f32 %v1801_v43 }
 0xa4d   :  { %vm923_vm15 = vmor %vm921_vm14, %vm922_vm13 }
 0xa4e   :  { %v918_v45 = vsub.f32 1.0, %v917_v44 }
 0xa50   :  { %v919_v46 = vmul.f32 %v1801_v43, %v918_v45 }
 0xa52   :  { %v920_v49 = vadd.f32 %v1801_v43, %v919_v46 }
 0xa54   :  { %v924_v56 = vsel %vm923_vm15, %v1801_v43, %v920_v49  ;;  %v1747_v43 = vld [vmem:[%s2574_s6 + $0x1] ss:$0 sm:$0xff] }
 0xa55   :  { %v929_v61 = vsel %vm926_vm1, %v928_v57, %v924_v56 }
 0xa56   :  { %v930_v4 = vmul.f32 %v1793_v26, %v929_v61 }
 0xa6b   :  { %v915_v50 = vpop.xlane.xlu2 %914 }
 0xa6c   :  { %1802 = vrcp.f32 %v915_v50  ;;  %v1072_v54 = vpop.xlane.xlu1 %1071  ;;  %v942_v6 = vand.u32 2147483648, %v915_v50  ;;  %v940_v11 = vand.u32 2147483647, %v915_v50  ;;  %vm936_vm3 = vweird.f32 %v915_v50 }
 0xa6d   :  { %1804 = vrcp.f32 %v1072_v54  ;;  %vm1081_vm11 = vweird.f32 %v1072_v54  ;;  %v1087_v21 = vand.u32 2147483648, %v1072_v54  ;;  %v1085_v24 = vand.u32 2147483647, %v1072_v54 }
 0xa6e   :  { %v943_v15 = vor.u32 1.1754944e-38, %v942_v6  ;;  %vm941_vm6 = vcmp.eq.f32.partialorder %v940_v11, 8.507059e+37  ;;  %v1687_v6 = vld [vmem:[%s2526_s12 + $0x28] sm:$0xff] }
 0xa6f   :  { %v1088_v28 = vor.u32 1.1754944e-38, %v1087_v21  ;;  %vm1086_vm15 = vcmp.eq.f32.partialorder %v1085_v24, 8.507059e+37 }
 0xa70   :  { %v1075_v59 = vpop.xlane.xlu0 %1074 }
 0xa71   :  { %1806 = vrcp.f32 %v1075_v59  ;;  %v1102_v22 = vand.u32 2147483648, %v1075_v59  ;;  %vm1096_vm13 = vweird.f32 %v1075_v59  ;;  %v1100_v26 = vand.u32 2147483647, %v1075_v59 }
 0xa72   :  { %v1803_v60 = vpop.eup %1802 }
 0xa73   :  { %v1805_v47 = vpop.eup %1804  ;;  %v932_v62 = vmul.f32 %v1803_v60, %v915_v50  ;;  %v1725_v63 = vpop.permute.xlu2 %1724  ;;  %vm937_vm2 = vweird.f32 %v1803_v60  ;;  %v1103_v29 = vor.u32 1.1754944e-38, %v1102_v22  ;;  %vm1101_vm1 = vcmp.eq.f32.partialorder %v1100_v26, 8.507059e+37 }
 0xa74   :  { %v1077_v1 = vmul.f32 %v1805_v47, %v1072_v54  ;;  %v1727_v2 = vunpack.i.h.bf16 %v1725_v63  ;;  %v1726_v52 = vunpack.i.l.bf16 %v1725_v63  ;;  %vm938_vm5 = vmor %vm936_vm3, %vm937_vm2  ;;  %vm1082_vm7 = vweird.f32 %v1805_v47 }
 0xa75   :  { %v933_v3 = vsub.f32 1.0, %v932_v62  ;;  %vm1083_vm12 = vmor %vm1081_vm11, %vm1082_vm7 }
 0xa76   :  { %v1078_v7 = vsub.f32 1.0, %v1077_v1  ;;  %967 = vmatpush.msra.mxu0 %v1726_v52  ;;  %993 = vmatpush.msrb.mxu3 %v1727_v2 }
 0xa77   :  { %v1807_v8 = vpop.eup %1806  ;;  %v934_v9 = vmul.f32 %v1803_v60, %v933_v3  ;;  %1671 = vmatmul.msk.f32.vlgmr.msra.gmra.mxu0 %vm258_vm9, %v930_v4  ;;  %v1688_v4 = vld [vmem:[%s2526_s12 + $0x30] sm:$0xff] }
 0xa78   :  { %v1079_v12 = vmul.f32 %v1805_v47, %v1078_v7  ;;  %v1092_v13 = vmul.f32 %v1807_v8, %v1075_v59  ;;  %vm1097_vm10 = vweird.f32 %v1807_v8  ;;  %v1686_v7 = vld [vmem:[%s2526_s12 + $0x20] sm:$0xff] }
 0xa79   :  { %v935_v14 = vadd.f32 %v1803_v60, %v934_v9  ;;  %vm1098_vm14 = vmor %vm1096_vm13, %vm1097_vm10 }
 0xa7a   :  { %v1093_v16 = vsub.f32 1.0, %v1092_v13  ;;  %v1080_v19 = vadd.f32 %v1805_v47, %v1079_v12 }
 0xa7b   :  { %v939_v17 = vsel %vm938_vm5, %v1803_v60, %v935_v14 }
 0xa7c   :  { %v944_v18 = vsel %vm941_vm6, %v943_v15, %v939_v17  ;;  %v1094_v20 = vmul.f32 %v1807_v8, %v1093_v16  ;;  %v1084_v0 = vsel %vm1083_vm12, %v1805_v47, %v1080_v19 }
 0xa7d   :  { %v945_v23 = vmul.f32 %v2294_v35, %v944_v18  ;;  %v1089_v30 = vsel %vm1086_vm15, %v1088_v28, %v1084_v0  ;;  %v1749_v0 = vld [vmem:[%s2525_s11 + $0x1] ss:$0 sm:$0xff]  ;;  %vm1584_vm15 = vcmask 1041408  }
 0xa7e   :  { %v1095_v25 = vadd.f32 %v1807_v8, %v1094_v20  ;;  %v1090_v34 = vmul.f32 %v2296_v37, %v1089_v30  ;;  %v1665_v37 = vld [vmem:[%s2573_s29 + $0x30] sm:$0xff] }
 0xa7f   :  { %1672 = vmatmul.msk.f32.vlgmr.msrb.gmra.mxu3 %vm258_vm9, %v945_v23  ;;  %1179 = vmatpush.msra.mxu1 %v1665_v37  ;;  %v1748_v23 = vld [vmem:[%s2575_s1 + $0x1] ss:$0 sm:$0xff] }
 0xa80   :  { %v1099_v27 = vsel %vm1098_vm14, %v1807_v8, %v1095_v25  ;;  %v1697_v37 = vld [vmem:[%s2528_s14 + $0x60] sm:$0xff]  ;;  %vm1454_vm14 = vcmask 1041409  }
 0xa81   :  { %v1104_v31 = vsel %vm1101_vm1, %v1103_v29, %v1099_v27 }
 0xa82   :  { %v1105_v35 = vmul.f32 %v2302_v36, %v1104_v31 }
 0xa84   :  { %v1730_v32 = vpop.permute.xlu1 %1729 }
 0xa85   :  { %v1732_v33 = vunpack.i.h.bf16 %v1730_v32  ;;  %v1731_v5 = vunpack.i.l.bf16 %v1730_v32 }
 0xa87   :  { %1127 = vmatpush.msrb.mxu0 %v1731_v5  ;;  %1153 = vmatpush.msra.mxu3 %v1732_v33 }
 0xa88   :  { %1677 = vmatmul.msk.f32.vlgmr.msrb.gmra.mxu0 %vm258_vm9, %v1090_v34  ;;  %1678 = vmatmul.msk.f32.vlgmr.msra.gmra.mxu3 %vm258_vm9, %v1105_v35  ;;  %v1700_v35 = vld [vmem:[%s2528_s14 + $0x78] sm:$0xff] }
 0xa89   :  { %1368 = vmatpush.msrb.mxu3 %v1700_v35 }
 0xa8b   :  { %1369 = vmatpush.msrb.mxu3 %v1699_v38 }
 0xa8d   :  { %1370 = vmatpush.msrb.mxu3 %v1698_v39 }
 0xa8f   :  { %1371 = vmatpush.msrb.mxu3 %v1697_v37 }
 0xaf4   :  { %v969_v36 = vpop.f32.mrf.mxu0 }
 0xaf5   :  { %1681 = vmatmul.msk.f32.vlgmr.msrb.gmra.mxu2 %vm196_vm8, %v969_v36  ;;  %v1696_v36 = vld [vmem:[%s2528_s14 + $0x58] sm:$0xff] }
 0xaf6   :  { %1372 = vmatpush.msrb.mxu3 %v1696_v36 }
 0xb02   :  { %v995_v40 = vpop.f32.mrf.mxu3 }
 0xb03   :  { %1682 = vmatmul.msk.f32.gmra.mxu2 %vm196_vm8, %v995_v40  ;;  %v1695_v40 = vld [vmem:[%s2528_s14 + $0x50] sm:$0xff] }
 0xb04   :  { %1373 = vmatpush.msrb.mxu3 %v1695_v40 }
 0xb05   :  { %v1129_v41 = vpop.f32.mrf.mxu0 }
 0xb06   :  { %1679 = vmatmul.msk.f32.vlgmr.msra.gmra.mxu1 %vm196_vm8, %v1129_v41  ;;  %v1694_v41 = vld [vmem:[%s2528_s14 + $0x48] sm:$0xff] }
 0xb07   :  { %1374 = vmatpush.msrb.mxu3 %v1694_v41 }
 0xb0b   :  { %v1155_v42 = vpop.f32.mrf.mxu3 }
 0xb0e   :  { %1680 = vmatmul.msk.f32.gmra.mxu1 %vm196_vm8, %v1155_v42  ;;  %v1693_v42 = vld [vmem:[%s2528_s14 + $0x40] sm:$0xff]  ;;  %s2581_s14 = sld [smem:[#allocation10_spill]] }
 0xb0f   :  { %1375 = vmatpush.msrb.mxu3 %v1693_v42  ;;  %v1752_v42 = vld [vmem:[%s2530_s16 + $0x1] ss:$0 sm:$0xff] }
 0xb78   :  { %v1210_v44 = vpop.f32.mrf.mxu2 }
 0xb83   :  { %v1181_v45 = vpop.f32.mrf.mxu1 }
 0xb84   :  { %v1211_v46 = vadd.f32 %v1210_v44, %v1181_v45 }
 0xb86   :  { %v1221_v48 = vadd.f32 %v1747_v43, %v1211_v46  ;;  %v1213_v51 = vpop.f32.mrf.mxu2 }
 0xb88   :  { %v1223_v49 = vadd.f32 %v1221_v48, %v2248_v53 }
 0xb8a   :  { %v1229_v50 = vsel %vm88_vm0, %v1223_v49, 0.0 }
 0xb8b   :  { %1230 = vadd.xlane.f32.xlu0 %v1229_v50  ;;  %v1184_v54 = vpop.f32.mrf.mxu1 }
 0xb8c   :  { %v1214_v55 = vadd.f32 %v1213_v51, %v1184_v54 }
 0xb8e   :  { %v1222_v56 = vadd.f32 %v1747_v43, %v1214_v55  ;;  %v1750_v43 = vld [vmem:[%s2527_s13 + $0x1] ss:$0 sm:$0xff]  ;;  %s1620_s13 = sshll.u32 %s2540_s26, 4  ;;  %s1621_s13 = int_to_ptr.hbm [resolvable:$true] %s1620_s13 }
 0xb90   :  { %v1224_v57 = vadd.f32 %v1222_v56, %v2252_v58  ;;  %v1689_v58 = vld [vmem:[%s2526_s12 + $0x38] sm:$0xff]  ;;  %s1609_s12 = sshll.u32 %s2539_s25, 4  ;;  %s1889_s25 = smov [#allocation4]   ;;  %s1610_s12 = int_to_ptr.hbm [resolvable:$true] %s1609_s12 }
 0xb91   :  { %1311 = vmatpush.msra.mxu0 %v1689_v58  ;;  %v1751_v58 = vld [vmem:[%s2529_s15 + $0x1] ss:$0 sm:$0xff]  ;;  %s1618_s4 = sshll.u32 %s1889_s25, 4  ;;  %s1619_s4 = int_to_ptr.vmem [resolvable:$true] %s1618_s4 }
 0xb92   :  { %v1232_v59 = vsel %vm88_vm0, %v1224_v57, 0.0 }
 0xb93   :  { %1233 = vadd.xlane.f32.xlu0 %v1232_v59  ;;  %1312 = vmatpush.msra.mxu0 %v1688_v4 }
 0xb95   :  { %1313 = vmatpush.msra.mxu0 %v1687_v6 }
 0xb97   :  { %1314 = vmatpush.msra.mxu0 %v1686_v7 }
 0xbfe   :  { %v1231_v60 = vpop.xlane.xlu0 %1230 }
 0xbff   :  { %v1235_v61 = vmul.f32 %v1231_v60, %v2033_v10 }
 0xc01   :  { %v1237_v47 = vsub.f32 %v1223_v49, %v1235_v61 }
 0xc03   :  { %v1239_v62 = vmul.f32 %v1237_v47, %v1237_v47 }
 0xc05   :  { %v1241_v63 = vsel %vm88_vm0, %v1239_v62, 0.0 }
 0xc06   :  { %1242 = vadd.xlane.f32.xlu0 %v1241_v63  ;;  %v1234_v53 = vpop.xlane.xlu0 %1233 }
 0xc07   :  { %v1236_v1 = vmul.f32 %v1234_v53, %v2033_v10 }
 0xc09   :  { %v1238_v2 = vsub.f32 %v1224_v57, %v1236_v1 }
 0xc0b   :  { %v1240_v52 = vmul.f32 %v1238_v2, %v1238_v2 }
 0xc0d   :  { %v1244_v3 = vsel %vm88_vm0, %v1240_v52, 0.0 }
 0xc0e   :  { %1245 = vadd.xlane.f32.xlu2 %v1244_v3 }
 0xc79   :  { %v1243_v8 = vpop.xlane.xlu0 %1242 }
 0xc7a   :  { %v1247_v9 = vmul.f32 %v1243_v8, %v2033_v10 }
 0xc7c   :  { %v1249_v11 = vadd.f32 1e-12, %v1247_v9 }
 0xc7e   :  { %1808 = vrsqrt.f32 %v1249_v11  ;;  %vm1257_vm9 = vweird.f32 %v1249_v11 }
 0xc81   :  { %v1246_v12 = vpop.xlane.xlu2 %1245 }
 0xc82   :  { %v1248_v13 = vmul.f32 %v1246_v12, %v2033_v10 }
 0xc84   :  { %v1809_v14 = vpop.eup %1808  ;;  %v1250_v15 = vadd.f32 1e-12, %v1248_v13 }
 0xc85   :  { %v1252_v16 = vmul.f32 %v1809_v14, %v1249_v11  ;;  %vm1258_vm8 = vweird.f32 %v1809_v14 }
 0xc86   :  { %1810 = vrsqrt.f32 %v1250_v15  ;;  %vm1259_vm2 = vmor %vm1257_vm9, %vm1258_vm8  ;;  %vm1267_vm5 = vweird.f32 %v1250_v15  ;;  %vm1600_vm8 = vcmask 0  }
 0xc87   :  { %v1253_v17 = vmul.f32 %v1809_v14, %v1252_v16 }
 0xc89   :  { %v1254_v18 = vmul.f32 0.5, %v1253_v17 }
 0xc8b   :  { %v1255_v19 = vsub.f32 1.5, %v1254_v18 }
 0xc8c   :  { %v1811_v20 = vpop.eup %1810 }
 0xc8d   :  { %v1256_v21 = vmul.f32 %v1809_v14, %v1255_v19  ;;  %v1262_v22 = vmul.f32 %v1811_v20, %v1250_v15  ;;  %vm1268_vm3 = vweird.f32 %v1811_v20 }
 0xc8e   :  { %vm1269_vm6 = vmor %vm1267_vm5, %vm1268_vm3 }
 0xc8f   :  { %v1260_v24 = vsel %vm1259_vm2, %v1809_v14, %v1256_v21  ;;  %v1263_v25 = vmul.f32 %v1811_v20, %v1262_v22 }
 0xc90   :  { %v1271_v26 = vmul.f32 %v1260_v24, %v1237_v47  ;;  %v1446_v24 = vld [vmem:[%s2532_s18 + $0x18] sm:$0xff] }
 0xc91   :  { %v1264_v27 = vmul.f32 0.5, %v1263_v25  ;;  %1470 = vmatpush.msrb.mxu1 %v1446_v24 }
 0xc92   :  { %v1276_v28 = vmul.f32 %v1748_v23, %v1271_v26 }
 0xc93   :  { %v1265_v29 = vsub.f32 1.5, %v1264_v27  ;;  %v1444_v27 = vld [vmem:[%s2532_s18 + $0x8] sm:$0xff] }
 0xc94   :  { %v1281_v30 = vadd.f32 %v1749_v0, %v1276_v28 }
 0xc95   :  { %v1266_v31 = vmul.f32 %v1811_v20, %v1265_v29  ;;  %v1443_v29 = vld [vmem:[%s2532_s18] sm:$0xff] }
 0xc96   :  { %1691 = vmatmul.msk.f32.vlgmr.msra.gmra.mxu0 %vm88_vm0, %v1281_v30 }
 0xc97   :  { %v1270_v32 = vsel %vm1269_vm6, %v1811_v20, %v1266_v31 }
 0xc98   :  { %v1272_v33 = vmul.f32 %v1270_v32, %v1238_v2 }
 0xc9a   :  { %v1277_v5 = vmul.f32 %v1748_v23, %v1272_v33 }
 0xc9c   :  { %v1282_v34 = vadd.f32 %v1749_v0, %v1277_v5  ;;  %v1445_v0 = vld [vmem:[%s2532_s18 + $0x10] sm:$0xff] }
 0xc9d   :  { %1471 = vmatpush.msrb.mxu1 %v1445_v0 }
 0xc9e   :  { %1692 = vmatmul.msk.f32.gmra.mxu0 %vm88_vm0, %v1282_v34 }
 0xc9f   :  { %1472 = vmatpush.msrb.mxu1 %v1444_v27  ;;  %v1757_v27 = vld [vmem:[%s2538_s24] ss:$0 sm:$0xff] }
 0xca1   :  { %1473 = vmatpush.msrb.mxu1 %v1443_v29 }
 0xd13   :  { %v1316_v44 = vpop.f32.mrf.mxu0 }
 0xd14   :  { %v1317_v45 = vadd.f32 %v1750_v43, %v1316_v44 }
 0xd16   :  { %v1322_v46 = vmul.f32 %v1317_v45, %v1317_v45 }
 0xd18   :  { %v1324_v48 = vmul.f32 %v1322_v46, %v1317_v45  ;;  %v1753_v46 = vld [vmem:[%s2531_s17 + $0x1] ss:$0 sm:$0xff]  ;;  %s1887_s17 = smov [#allocation2]  }
 0xd19   :  { %s1607_s8 = sshll.u32 %s1887_s17, 4  ;;  %s1608_s8 = int_to_ptr.vmem [resolvable:$true] %s1607_s8 }
 0xd1a   :  { %v1326_v49 = vmul.f32 0.044715, %v1324_v48 }
 0xd1b   :  { %v1319_v50 = vpop.f32.mrf.mxu0 }
 0xd1c   :  { %v1328_v51 = vadd.f32 %v1326_v49, %v1317_v45  ;;  %v1320_v54 = vadd.f32 %v1750_v43, %v1319_v50 }
 0xd1e   :  { %v1330_v55 = vmul.f32 0.7978846, %v1328_v51  ;;  %v1323_v56 = vmul.f32 %v1320_v54, %v1320_v54 }
 0xd20   :  { %1812 = vtanh.f32 %v1330_v55  ;;  %v1325_v57 = vmul.f32 %v1323_v56, %v1320_v54 }
 0xd22   :  { %v1327_v59 = vmul.f32 0.044715, %v1325_v57 }
 0xd24   :  { %v1329_v60 = vadd.f32 %v1327_v59, %v1320_v54  ;;  %v1482_v59 = vld [vmem:[%s2534_s20 + $0x18] sm:$0xff] }
 0xd25   :  { %1509 = vmatpush.msra.mxu2 %v1482_v59 }
 0xd26   :  { %v1813_v61 = vpop.eup %1812  ;;  %v1331_v47 = vmul.f32 0.7978846, %v1329_v60  ;;  %v1481_v60 = vld [vmem:[%s2534_s20 + $0x10] sm:$0xff] }
 0xd27   :  { %v1334_v62 = vadd.f32 1.0, %v1813_v61  ;;  %v1480_v61 = vld [vmem:[%s2534_s20 + $0x8] sm:$0xff]  ;;  %1510 = vmatpush.msra.mxu2 %v1481_v60 }
 0xd28   :  { %1814 = vtanh.f32 %v1331_v47  ;;  %v1479_v47 = vld [vmem:[%s2534_s20] sm:$0xff] }
 0xd29   :  { %v1336_v63 = vmul.f32 0.5, %v1334_v62  ;;  %1511 = vmatpush.msra.mxu2 %v1480_v61  ;;  %v1483_v62 = vld [vmem:[%s2581_s14] sm:$0x3] }
 0xd2b   :  { %v1338_v53 = vmul.f32 %v1336_v63, %v1317_v45  ;;  %1512 = vmatpush.msra.mxu2 %v1479_v47  ;;  %v1538_v63 = vld [vmem:[%s2537_s23 + $0x78] sm:$0xff] }
 0xd2c   :  { %1543 = vmatpush.msrb.mxu0 %v1538_v63 }
 0xd2d   :  { %1702 = vmatmul.msk.f32.vlgmr.msrb.gmra.mxu3 %vm708_vm4, %v1338_v53  ;;  %v1537_v53 = vld [vmem:[%s2537_s23 + $0x70] sm:$0xff] }
 0xd2e   :  { %v1815_v1 = vpop.eup %1814  ;;  %1544 = vmatpush.msrb.mxu0 %v1537_v53 }
 0xd2f   :  { %v1335_v2 = vadd.f32 1.0, %v1815_v1  ;;  %v1886_v1 = vmov 0  }
 0xd30   :  { %1733 = vset.pattern.permute.xlu0 %v1886_v1 }
 0xd31   :  { %v1337_v52 = vmul.f32 0.5, %v1335_v2  ;;  %v1536_v2 = vld [vmem:[%s2537_s23 + $0x68] sm:$0xff] }
 0xd32   :  { %1545 = vmatpush.msrb.mxu0 %v1536_v2 }
 0xd33   :  { %v1339_v3 = vmul.f32 %v1337_v52, %v1320_v54  ;;  %v1535_v52 = vld [vmem:[%s2537_s23 + $0x60] sm:$0xff] }
 0xd34   :  { %1546 = vmatpush.msrb.mxu0 %v1535_v52 }
 0xd35   :  { %1703 = vmatmul.msk.f32.gmra.mxu3 %vm708_vm4, %v1339_v3  ;;  %v1534_v3 = vld [vmem:[%s2537_s23 + $0x58] sm:$0xff] }
 0xd36   :  { %1547 = vmatpush.msrb.mxu0 %v1534_v3 }
 0xdb0   :  { %v1377_v4 = vpop.f32.mrf.mxu3 }
 0xdb1   :  { %v1378_v6 = vadd.f32 %v1751_v58, %v1377_v4  ;;  %v1532_v4 = vld [vmem:[%s2537_s23 + $0x48] sm:$0xff] }
 0xdb3   :  { %v1383_v7 = vadd.f32 %v1378_v6, %v1281_v30  ;;  %v1531_v6 = vld [vmem:[%s2537_s23 + $0x40] sm:$0xff] }
 0xdb5   :  { %v1389_v8 = vsel %vm88_vm0, %v1383_v7, 0.0 }
 0xdb6   :  { %1390 = vadd.xlane.f32.xlu1 %v1389_v8  ;;  %v1529_v8 = vld [vmem:[%s2537_s23 + $0x30] sm:$0xff] }
 0xdb8   :  { %v1380_v9 = vpop.f32.mrf.mxu3 }
 0xdb9   :  { %v1381_v11 = vadd.f32 %v1751_v58, %v1380_v9  ;;  %v1533_v58 = vld [vmem:[%s2537_s23 + $0x50] sm:$0xff]  ;;  %v1528_v9 = vld [vmem:[%s2537_s23 + $0x28] sm:$0xff] }
 0xdba   :  { %1548 = vmatpush.msrb.mxu0 %v1533_v58 }
 0xdbb   :  { %v1384_v12 = vadd.f32 %v1381_v11, %v1282_v34  ;;  %v1754_v11 = vld [vmem:[%s2533_s19] ss:$0 sm:$0xff] }
 0xdbc   :  { %1549 = vmatpush.msrb.mxu0 %v1532_v4 }
 0xdbd   :  { %v1392_v13 = vsel %vm88_vm0, %v1384_v12, 0.0 }
 0xdbe   :  { %1393 = vadd.xlane.f32.xlu0 %v1392_v13  ;;  %1550 = vmatpush.msrb.mxu0 %v1531_v6 }
 0xe29   :  { %v1391_v14 = vpop.xlane.xlu1 %1390 }
 0xe2a   :  { %v1395_v17 = vmul.f32 %v1391_v14, %v2033_v10 }
 0xe2c   :  { %v1397_v20 = vsub.f32 %v1383_v7, %v1395_v17  ;;  %v1530_v7 = vld [vmem:[%s2537_s23 + $0x38] sm:$0xff]  ;;  %v1525_v17 = vld [vmem:[%s2537_s23 + $0x10] sm:$0xff] }
 0xe2d   :  { %1551 = vmatpush.msrb.mxu0 %v1530_v7 }
 0xe2e   :  { %v1399_v22 = vmul.f32 %v1397_v20, %v1397_v20 }
 0xe2f   :  { %1552 = vmatpush.msrb.mxu0 %v1529_v8 }
 0xe30   :  { %v1401_v23 = vsel %vm88_vm0, %v1399_v22, 0.0 }
 0xe31   :  { %v1394_v15 = vpop.xlane.xlu0 %1393  ;;  %1553 = vmatpush.msrb.mxu0 %v1528_v9 }
 0xe32   :  { %v1396_v16 = vmul.f32 %v1394_v15, %v2033_v10 }
 0xe34   :  { %v1398_v18 = vsub.f32 %v1384_v12, %v1396_v16  ;;  %v1527_v12 = vld [vmem:[%s2537_s23 + $0x20] sm:$0xff]  ;;  %v1526_v16 = vld [vmem:[%s2537_s23 + $0x18] sm:$0xff] }
 0xe35   :  { %1554 = vmatpush.msrb.mxu0 %v1527_v12 }
 0xe36   :  { %v1400_v19 = vmul.f32 %v1398_v18, %v1398_v18 }
 0xe37   :  { %1555 = vmatpush.msrb.mxu0 %v1526_v16 }
 0xe38   :  { %v1404_v21 = vsel %vm88_vm0, %v1400_v19, 0.0  ;;  %v1523_v19 = vld [vmem:[%s2537_s23] sm:$0xff] }
 0xe39   :  { %1405 = vadd.xlane.f32.xlu0 %v1404_v21  ;;  %1556 = vmatpush.msrb.mxu0 %v1525_v17 }
 0xe41   :  { %1402 = vadd.xlane.f32.xlu0 %v1401_v23  ;;  %v1756_v23 = vld [vmem:[%s2536_s22] ss:$0 sm:$0xff] }
 0xe55   :  { %1487 = vperm.xlu0 %1733, %v1483_v62  }
 0xeac   :  { %v1406_v25 = vpop.xlane.xlu0 %1405 }
 0xead   :  { %v1408_v26 = vmul.f32 %v1406_v25, %v2033_v10 }
 0xeaf   :  { %v1410_v28 = vadd.f32 1e-12, %v1408_v26 }
 0xeb1   :  { %1816 = vrsqrt.f32 %v1410_v28  ;;  %vm1427_vm7 = vweird.f32 %v1410_v28 }
 0xeb4   :  { %v1403_v30 = vpop.xlane.xlu0 %1402 }
 0xeb5   :  { %v1407_v31 = vmul.f32 %v1403_v30, %v2033_v10 }
 0xeb7   :  { %v1817_v32 = vpop.eup %1816  ;;  %v1409_v33 = vadd.f32 1e-12, %v1407_v31 }
 0xeb8   :  { %v1422_v5 = vmul.f32 %v1817_v32, %v1410_v28  ;;  %vm1428_vm4 = vweird.f32 %v1817_v32 }
 0xeb9   :  { %1818 = vrsqrt.f32 %v1409_v33  ;;  %vm1429_vm10 = vmor %vm1427_vm7, %vm1428_vm4  ;;  %vm1417_vm12 = vweird.f32 %v1409_v33 }
 0xeba   :  { %v1423_v34 = vmul.f32 %v1817_v32, %v1422_v5 }
 0xebc   :  { %v1424_v35 = vmul.f32 0.5, %v1423_v34 }
 0xebe   :  { %v1425_v38 = vsub.f32 1.5, %v1424_v35 }
 0xebf   :  { %v1819_v39 = vpop.eup %1818 }
 0xec0   :  { %v1426_v37 = vmul.f32 %v1817_v32, %v1425_v38  ;;  %v1412_v36 = vmul.f32 %v1819_v39, %v1409_v33  ;;  %vm1418_vm11 = vweird.f32 %v1819_v39 }
 0xec1   :  { %vm1419_vm13 = vmor %vm1417_vm12, %vm1418_vm11 }
 0xec2   :  { %v1430_v40 = vsel %vm1429_vm10, %v1817_v32, %v1426_v37  ;;  %v1413_v41 = vmul.f32 %v1819_v39, %v1412_v36 }
 0xec3   :  { %v1432_v10 = vmul.f32 %v1430_v40, %v1398_v18  ;;  %v1524_v18 = vld [vmem:[%s2537_s23 + $0x8] sm:$0xff]  ;;  %s2582_s23 = sld [smem:[#allocation11_spill]] }
 0xec4   :  { %v1414_v43 = vmul.f32 0.5, %v1413_v41  ;;  %1557 = vmatpush.msrb.mxu0 %v1524_v18 }
 0xec5   :  { %v1437_v45 = vmul.f32 %v1752_v42, %v1432_v10  ;;  %v1888_v10 = vmov 2.0  }
 0xec6   :  { %v1415_v44 = vsub.f32 1.5, %v1414_v43  ;;  %1558 = vmatpush.msrb.mxu0 %v1523_v19 }
 0xec7   :  { %v1442_v51 = vadd.f32 %v1753_v46, %v1437_v45  ;;  %v1488_v21 = vpop.permute.xlu0 %1487 }
 0xec8   :  { %v1416_v48 = vmul.f32 %v1819_v39, %v1415_v44 }
 0xec9   :  { %v1453_v56 = vrot.slane %v1442_v51, 7  ;;  %v1578_v36 = vld [vmem:[%s2582_s23] sm:$0x3] }
 0xeca   :  { %v1420_v49 = vsel %vm1419_vm13, %v1819_v39, %v1416_v48 }
 0xecb   :  { %v1431_v50 = vmul.f32 %v1420_v49, %v1397_v20  ;;  %v1755_v20 = vld [vmem:[%s2535_s21] ss:$0 sm:$0xff] }
 0xecc   :  { %v1493_v22 = vmul.f32 %v1755_v20, %v1488_v21 }
 0xecd   :  { %v1436_v54 = vmul.f32 %v1752_v42, %v1431_v50 }
 0xecf   :  { %v1441_v55 = vadd.f32 %v1753_v46, %v1436_v54 }
 0xed1   :  { %v1455_v57 = vsel %vm1454_vm14, %v1453_v56, %v1441_v55 }
 0xed2   :  { %1706 = vmatmul.msk.f32.vlgmr.msrb.gmra.mxu1 %vm88_vm0, %v1455_v57 }
 0xf4f   :  { %v1475_v13 = vpop.f32.mrf.mxu1 }
 0xf50   :  { %v1476_v14 = vadd.f32 %v1754_v11, %v1475_v13 }
 0xf52   :  { %1820 = vtanh.f32 %v1476_v14 }
 0xf58   :  { %v1821_v15 = vpop.eup %1820 }
 0xf59   :  { %1707 = vmatmul.msk.f32.vlgmr.msra.gmra.mxu2 %vm88_vm0, %v1821_v15  ;;  %vm1563_vm0 = vcmask 17408  }
 0xfdc   :  { %v1514_v24 = vpop.f32.mrf.mxu2 }
 0xfdd   :  { %v1515_v25 = vadd.f32 %v1514_v24, %v1493_v22 }
 0xfdf   :  { %v1521_v26 = vadd.f32 %v1756_v23, %v1515_v25 }
 0xfe1   :  { %v1522_v0 = vmax.f32 %v1521_v26, 0.0 }
 0xfe3   :  { %1559 = vmatmul.f32.vlgmr.msrb.gmra.mxu0 %v1522_v0 }
0x1060   :  { %v1560_v28 = vpop.f32.mrf.mxu0 }
0x1061   :  { %v1561_v29 = vadd.f32 %v1757_v27, %v1560_v28 }
0x1063   :  { %v1565_v30 = vsel %vm1563_vm0, %v1561_v29, -inf  ;;  %1564 = vst.msk [vmem:[#allocation2] sm:$0x3] %vm1563_vm0, %v1561_v29 }
0x1064   :  { %1566 = vmax.xlane.f32.xlu2 %v1565_v30  ;;  %1612 = dma.vmem_to_hbm [thread:$0]  %s1608_s8, 32, %s1610_s12, [#allocation3]  }
0x10d7   :  { %v1567_v31 = vpop.xlane.xlu2 %1566 }
0x10d8   :  { %v1568_v32 = vsub.f32 %v1561_v29, %v1567_v31 }
0x10da   :  { %v1569_v33 = vmul.f32 1.442695, %v1568_v32 }
0x10dc   :  { %1822 = vpow2.f32 %v1569_v33 }
0x10e2   :  { %v1823_v5 = vpop.eup %1822 }
0x10e3   :  { %v1571_v34 = vsel %vm1563_vm0, %v1823_v5, 0.0 }
0x10e4   :  { %1572 = vadd.xlane.f32.xlu1 %v1571_v34 }
0x1157   :  { %v1573_v35 = vpop.xlane.xlu1 %1572 }
0x1158   :  { %1824 = vlog2.f32 %v1573_v35 }
0x1159   :  { %1826 = vrcp.f32 %v1888_v10 }
0x115e   :  { %v1825_v38 = vpop.eup %1824 }
0x115f   :  { %v1575_v39 = vmul.f32 0.6931472, %v1825_v38  ;;  %v1827_v43 = vpop.eup %1826 }
0x1160   :  { %v1593_v44 = vmul.f32 2.0, %v1827_v43  ;;  %vm1597_vm1 = vweird.f32 %v1827_v43 }
0x1161   :  { %v1576_v37 = vadd.f32 %v1575_v39, %v1567_v31 }
0x1162   :  { %v1594_v48 = vsub.f32 1.0, %v1593_v44 }
0x1163   :  { %v1577_v40 = vsub.f32 %v1561_v29, %v1576_v37 }
0x1164   :  { %v1595_v51 = vmul.f32 %v1827_v43, %v1594_v48 }
0x1165   :  { %v1579_v41 = vmul.f32 %v1578_v36, %v1577_v40 }
0x1166   :  { %v1596_v56 = vadd.f32 %v1827_v43, %v1595_v51 }
0x1167   :  { %v1580_v42 = vsel %vm1563_vm0, %v1579_v41, 0.0 }
0x1168   :  { %1581 = vadd.xlane.f32.xlu2 %v1580_v42  ;;  %v1598_v60 = vsel %vm1597_vm1, %v1827_v43, %v1596_v56 }
0x11db   :  { %v1582_v45 = vpop.xlane.xlu2 %1581 }
0x11dc   :  { %v1583_v46 = vsub.f32 0.0, %v1582_v45 }
0x11de   :  { %v1585_v49 = vsel %vm1584_vm15, %v1583_v46, 0.0 }
0x11df   :  { %v1586_v50 = vrot.slane %v1585_v49, 4 }
0x11e1   :  { %v1587_v54 = vadd.f32 %v1586_v50, %v1585_v49 }
0x11e3   :  { %v1588_v55 = vrot.slane %v1587_v54, 2 }
0x11e5   :  { %v1589_v57 = vadd.f32 %v1588_v55, %v1587_v54 }
0x11e7   :  { %v1590_v59 = vrot.slane %v1589_v57, 1 }
0x11e9   :  { %v1591_v61 = vadd.f32 %v1590_v59, %v1589_v57 }
0x11eb   :  { %v1599_v47 = vmul.f32 %v1598_v60, %v1591_v61 }
0x11ed   :  { %1601 = vst.msk [vmem:[#allocation4] sm:$0x1] %vm1600_vm8, %v1599_v47 }
0x11ee   :  { %1623 = dma.vmem_to_hbm [thread:$0]  %s1619_s4, 16, %s1621_s13, [#allocation5]  }
0x11ef   :  { %1876 = dma.done.wait [#allocation3], 32  }
0x11f0   :  { %1877 = vsyncadd [#allocation3], 4294967264 }
0x11f1   :  { %1878 = dma.done.wait [#allocation5], 16  }
0x11f2   :  { %1879 = vsyncadd [#allocation5], 4294967280 }
0x11f3   :  { %1632 = vsyncpa [#allocation3], 1 }
0x11f4   :  { %1633 = vsyncpa [#allocation5], 1 }

</bundles_post_ra>
